<compile_context>
chip_gen: v7x
topology: tpu7x:2x2x1
jax: 0.10.0
libtpu: 0.0.40
codegen_flags: <defaults>
</compile_context>

<pallas_src>
import math
import functools

import jax
import jax.numpy as jnp
from jax import lax
from jax.experimental import pallas as pl
from jax.experimental.pallas import tpu as pltpu

# ----------------------------- config ---------------------------------------
B = 2            # batch size (per view)
S = 8            # sequence length
H = 32           # hidden size
HEADS = 2        # attention heads
DH = H // HEADS
FF = 64          # feed-forward inner size
LAYERS = 2
VOCAB = 64
SEG_VOCAB = 3
LN_EPS = 1e-6
POOLING_TYPE = "mean"
VIEWS = 2

VB = VIEWS * B       # sequences processed per kernel invocation
R = VB * S           # activation rows ([R, H] matmul operand)
EMB_ROWS = 128       # word(64) + pos(8) + seg(3) rows, zero-padded to 128 lanes


# ----------------------------- in-kernel helpers -----------------------------
def _gelu(x):
    # TODO(synk): UER's default gelu is erf-based; tanh approximation used here
    # (erf lowering not relied upon) -> tiny systematic activation mismatch.
    return 0.5 * x * (1.0 + jnp.tanh(0.7978845608028654 * (x + 0.044715 * x * x * x)))


def _layernorm(x, g, b):
    mean = jnp.mean(x, axis=-1, keepdims=True)
    var = jnp.mean((x - mean) * (x - mean), axis=-1, keepdims=True)
    return (x - mean) * lax.rsqrt(var + LN_EPS) * g + b


# ----------------------------- fused encoder kernel --------------------------
def _simcse_kernel(ids_ref, seg_ref, emb_tab_ref, glob_ref,
                   wqkv_ref, wo_ref, w1_ref, w2_ref, vec_ref,
                   feat_ref):
    """Whole SimCSE forward (both views) in a single invocation; activations
    stay vreg/VMEM-resident end to end."""
    # ---- fused embedding lookup: one-hot (iota compare) @ combined table ----
    lane = lax.broadcasted_iota(jnp.int32, (R, EMB_ROWS), 1)
    hit = (lane == ids_ref[0]) | (lane == ids_ref[1]) | (lane == ids_ref[2])
    onehot = jnp.where(hit, 1.0, 0.0)                                  # [R, 128]
    x = jnp.dot(onehot, emb_tab_ref[...],
                preferred_element_type=jnp.float32)                    # [R, H]
    x = _layernorm(x, glob_ref[0:1, :H], glob_ref[1:2, :H])

    # ---- masks: attention uses (seg > 0); pooling uses raw seg (spec) -------
    seg_raw = seg_ref[...]                                             # [VB, S]
    attn_mask = jnp.where(seg_raw > 0.0, 1.0, 0.0)
    bias = ((1.0 - attn_mask) * -10000.0)[:, None, :]                  # [VB, 1, S]

    for l in range(LAYERS):                       # LAYERS=2: static unroll
        # fused QKV projection; 1/sqrt(DH) already folded into the Q columns.
        qkv = jnp.dot(x, wqkv_ref[l],
                      preferred_element_type=jnp.float32) + vec_ref[l, 0:1, :3 * H]
        attn_out = vec_ref[l, 1:2, :H]            # bo folded into the accumulator
        for h in range(HEADS):                    # HEADS=2: static unroll
            q = qkv[:, h * DH:(h + 1) * DH].reshape(VB, S, DH)
            k = qkv[:, H + h * DH:H + (h + 1) * DH].reshape(VB, S, DH)
            v = qkv[:, 2 * H + h * DH:2 * H + (h + 1) * DH].reshape(VB, S, DH)
            s = jnp.einsum("bqd,bkd->bqk", q, k,
                           preferred_element_type=jnp.float32) + bias  # [VB, S, S]
            s = s - jnp.max(s, axis=-1, keepdims=True)
            p = jnp.exp(s)
            p = p * pl.reciprocal(jnp.sum(p, axis=-1, keepdims=True), approx=True)
            ctx = jnp.einsum("bqk,bkd->bqd", p, v,
                             preferred_element_type=jnp.float32)       # [VB, S, DH]
            # accumulate the per-head slice of the output projection
            attn_out = attn_out + jnp.dot(ctx.reshape(R, DH),
                                          wo_ref[l, h * DH:(h + 1) * DH, :],
                                          preferred_element_type=jnp.float32)
        x = _layernorm(x + attn_out, vec_ref[l, 4:5, :H], vec_ref[l, 5:6, :H])

        ff = _gelu(jnp.dot(x, w1_ref[l],
                           preferred_element_type=jnp.float32) + vec_ref[l, 2:3, :FF])
        ff = jnp.dot(ff, w2_ref[l],
                     preferred_element_type=jnp.float32) + vec_ref[l, 3:4, :H]
        x = _layernorm(x + ff, vec_ref[l, 6:7, :H], vec_ref[l, 7:8, :H])

    # ---- masked mean pooling (POOLING_TYPE == "mean"), raw-seg weighting ----
    # TODO(synk): 'last'/'max'/'first' pooling types are not fused in-kernel.
    pool_w = seg_raw[:, :, None]                                       # [VB, S, 1]
    num = jnp.sum(x.reshape(VB, S, H) * pool_w, axis=1)                # [VB, H]
    den = jnp.sum(pool_w, axis=1)                                      # [VB, 1]
    feat_ref[...] = num * pl.reciprocal(den, approx=True)


def simcse_encode(packed, ids, seg_f):
    """ids: [3, R, 1] int32; seg_f: [VB, S] float32 -> features [VB, H]."""
    vmem = pl.BlockSpec(memory_space=pltpu.MemorySpace.VMEM)
    return pl.pallas_call(
        _simcse_kernel,
        out_shape=jax.ShapeDtypeStruct((VB, H), jnp.float32),
        in_specs=[vmem] * 9,
        out_specs=vmem,
    )(ids, seg_f, packed["emb_table"], packed["glob_vec"],
      packed["wqkv"], packed["wo"], packed["w1"], packed["w2"],
      packed["layer_vec"])


# ----------------------------- params ----------------------------------------
def init_params(key):
    def nrm(k, shape, scale=0.02):
        return scale * jax.random.normal(k, shape, dtype=jnp.float32)

    keys = jax.random.split(key, 4 + LAYERS)
    params = {
        "word_emb": nrm(keys[0], (VOCAB, H)),
        "pos_emb": nrm(keys[1], (S, H)),
        "seg_emb": nrm(keys[2], (SEG_VOCAB, H)),
        "emb_ln_g": jnp.ones((H,), jnp.float32),
        "emb_ln_b": jnp.zeros((H,), jnp.float32),
        "layers": [],
    }
    for l in range(LAYERS):
        lk = jax.random.split(keys[4 + l], 6)
        params["layers"].append({
            "wq": nrm(lk[0], (H, H)), "bq": jnp.zeros((H,), jnp.float32),
            "wk": nrm(lk[1], (H, H)), "bk": jnp.zeros((H,), jnp.float32),
            "wv": nrm(lk[2], (H, H)), "bv": jnp.zeros((H,), jnp.float32),
            "wo": nrm(lk[3], (H, H)), "bo": jnp.zeros((H,), jnp.float32),
            "w1": nrm(lk[4], (H, FF)), "b1": jnp.zeros((FF,), jnp.float32),
            "w2": nrm(lk[5], (FF, H)), "b2": jnp.zeros((H,), jnp.float32),
            "ln1_g": jnp.ones((H,), jnp.float32), "ln1_b": jnp.zeros((H,), jnp.float32),
            "ln2_g": jnp.ones((H,), jnp.float32), "ln2_b": jnp.zeros((H,), jnp.float32),
        })
    return params


def pack_params(params):
    """Build the fused kernel inputs:
       - emb_table: [128, H] = [word | pos | seg | zero-pad] rows
       - glob_vec:  [8, 128] (row0=emb_ln_g, row1=emb_ln_b)
       - wqkv [L,H,3H] (scale folded into Q), wo [L,H,H], w1 [L,H,FF], w2 [L,FF,H]
       - layer_vec: [L, 8, 128] rows = bqkv, bo, b1, b2, ln1_g, ln1_b, ln2_g, ln2_b
    """
    scale = 1.0 / math.sqrt(DH)

    tab = jnp.zeros((EMB_ROWS, H), jnp.float32)
    tab = tab.at[:VOCAB].set(params["word_emb"])
    tab = tab.at[VOCAB:VOCAB + S].set(params["pos_emb"])
    tab = tab.at[VOCAB + S:VOCAB + S + SEG_VOCAB].set(params["seg_emb"])

    glob = jnp.zeros((8, 128), jnp.float32)
    glob = glob.at[0, :H].set(params["emb_ln_g"])
    glob = glob.at[1, :H].set(params["emb_ln_b"])

    wqkv, wo, w1, w2, vec = [], [], [], [], []
    for lp in params["layers"]:
        wqkv.append(jnp.concatenate([lp["wq"] * scale, lp["wk"], lp["wv"]], axis=1))
        wo.append(lp["wo"]); w1.append(lp["w1"]); w2.append(lp["w2"])
        v = jnp.zeros((8, 128), jnp.float32)
        v = v.at[0, :3 * H].set(jnp.concatenate([lp["bq"] * scale, lp["bk"], lp["bv"]]))
        v = v.at[1, :H].set(lp["bo"])
        v = v.at[2, :FF].set(lp["b1"])
        v = v.at[3, :H].set(lp["b2"])
        v = v.at[4, :H].set(lp["ln1_g"]); v = v.at[5, :H].set(lp["ln1_b"])
        v = v.at[6, :H].set(lp["ln2_g"]); v = v.at[7, :H].set(lp["ln2_b"])
        vec.append(v)

    return {"emb_table": tab, "glob_vec": glob,
            "wqkv": jnp.stack(wqkv), "wo": jnp.stack(wo),
            "w1": jnp.stack(w1), "w2": jnp.stack(w2),
            "layer_vec": jnp.stack(vec)}


# ----------------------------- forward ----------------------------------------
def simcse_forward(packed, src, seg):
    """src, seg: [VIEWS, B, S] int32 (two augmented views). Returns (features_0, features_1)."""
    src_flat = src.reshape(R)
    seg_flat = seg.reshape(R)
    pos_flat = jnp.tile(jnp.arange(S, dtype=jnp.int32), VB)
    # Row-wise indices into the combined [word | pos | seg] embedding table.
    ids = jnp.stack([src_flat,
                     VOCAB + pos_flat,
                     VOCAB + S + seg_flat]).astype(jnp.int32).reshape(3, R, 1)
    seg_f = seg.reshape(VB, S).astype(jnp.float32)
    feats = simcse_encode(packed, ids, seg_f)           # [VB, H]
    feats = feats.reshape(VIEWS, B, H)
    return feats[0], feats[1]


# ----------------------------- main ------------------------------------------
if __name__ == "__main__":
    key = jax.random.PRNGKey(0)
    k_param, k_tok = jax.random.split(key)

    params = init_params(k_param)
    packed = pack_params(params)

    # token ids for two views, values in [1, VOCAB)
    src = jax.random.randint(k_tok, (VIEWS, B, S), 1, VOCAB, dtype=jnp.int32)

    # segment masks: 1 for real tokens, 0 for padding (different lengths)
    lengths = jnp.array([[8, 5], [6, 8]], dtype=jnp.int32)      # [2 views, B]
    pos = jnp.arange(S, dtype=jnp.int32)[None, None, :]          # [1, 1, S]
    seg = (pos < lengths[:, :, None]).astype(jnp.int32)          # [2, B, S]
    src = src * seg                                              # pad token id 0

    fwd = jax.jit(functools.partial(simcse_forward, packed))
    f0, f1 = fwd(src, seg)
    jax.block_until_ready((f0, f1))

    assert f0.shape == (B, H) and f1.shape == (B, H)
    assert bool(jnp.all(jnp.isfinite(f0))) and bool(jnp.all(jnp.isfinite(f1)))
    print("KERNEL_OK")
</pallas_src>

<mosaic_0001>
module attributes {stable_mosaic.version = 11 : i64} {
  func.func @_simcse_kernel(%arg0: memref<3x32x1xi32, #tpu.memory_space<vmem>>, %arg1: memref<4x8xf32, #tpu.memory_space<vmem>>, %arg2: memref<128x32xf32, #tpu.memory_space<vmem>>, %arg3: memref<8x128xf32, #tpu.memory_space<vmem>>, %arg4: memref<2x32x96xf32, #tpu.memory_space<vmem>>, %arg5: memref<2x32x32xf32, #tpu.memory_space<vmem>>, %arg6: memref<2x32x64xf32, #tpu.memory_space<vmem>>, %arg7: memref<2x64x32xf32, #tpu.memory_space<vmem>>, %arg8: memref<2x8x128xf32, #tpu.memory_space<vmem>>, %arg9: memref<4x32xf32, #tpu.memory_space<vmem>>) attributes {dimension_semantics = [], scalar_prefetch = 0 : i64, scratch_operands = 0 : i64, tpu.core_type = #tpu.core_type<tc>} {
    %0 = tpu.iota {dimensions = array<i32: 1>} : vector<32x128xi32>
    %c0 = arith.constant 0 : index
    %c0_0 = arith.constant 0 : index
    %c0_1 = arith.constant 0 : index
    %1 = vector.load %arg0[%c0, %c0_0, %c0_1] : memref<3x32x1xi32, #tpu.memory_space<vmem>>, vector<1x32x1xi32>
    %2 = vector.shape_cast %1 : vector<1x32x1xi32> to vector<32x1xi32>
    %3 = vector.broadcast %2 : vector<32x1xi32> to vector<32x128xi32>
    %4 = arith.cmpi eq, %0, %3 : vector<32x128xi32>
    %c1 = arith.constant 1 : index
    %c0_2 = arith.constant 0 : index
    %c0_3 = arith.constant 0 : index
    %5 = vector.load %arg0[%c1, %c0_2, %c0_3] : memref<3x32x1xi32, #tpu.memory_space<vmem>>, vector<1x32x1xi32>
    %6 = vector.shape_cast %5 : vector<1x32x1xi32> to vector<32x1xi32>
    %7 = vector.broadcast %6 : vector<32x1xi32> to vector<32x128xi32>
    %8 = arith.cmpi eq, %0, %7 : vector<32x128xi32>
    %9 = arith.ori %4, %8 : vector<32x128xi1>
    %c2 = arith.constant 2 : index
    %c0_4 = arith.constant 0 : index
    %c0_5 = arith.constant 0 : index
    %10 = vector.load %arg0[%c2, %c0_4, %c0_5] : memref<3x32x1xi32, #tpu.memory_space<vmem>>, vector<1x32x1xi32>
    %11 = vector.shape_cast %10 : vector<1x32x1xi32> to vector<32x1xi32>
    %12 = vector.broadcast %11 : vector<32x1xi32> to vector<32x128xi32>
    %13 = arith.cmpi eq, %0, %12 : vector<32x128xi32>
    %14 = arith.ori %9, %13 : vector<32x128xi1>
    %cst = arith.constant 1.000000e+00 : f32
    %cst_6 = arith.constant 0.000000e+00 : f32
    %15 = vector.broadcast %cst : f32 to vector<32x128xf32>
    %16 = vector.broadcast %cst_6 : f32 to vector<32x128xf32>
    %17 = arith.select %14, %15, %16 : vector<32x128xi1>, vector<32x128xf32>
    %c0_7 = arith.constant 0 : index
    %c0_8 = arith.constant 0 : index
    %18 = vector.load %arg2[%c0_7, %c0_8] : memref<128x32xf32, #tpu.memory_space<vmem>>, vector<128x32xf32>
    %cst_9 = arith.constant dense<0.000000e+00> : vector<32x32xf32>
    %19 = tpu.matmul %17, %18, %cst_9 {dimension_numbers = #tpu.dot_dimension_numbers<[1], [0], [0], [1], [0, 0, 1, 1], [], []>} : vector<32x128xf32>, vector<128x32xf32>, vector<32x32xf32> -> vector<32x32xf32>
    %c0_10 = arith.constant 0 : index
    %c0_11 = arith.constant 0 : index
    %20 = vector.load %arg3[%c0_10, %c0_11] : memref<8x128xf32, #tpu.memory_space<vmem>>, vector<1x32xf32>
    %c1_12 = arith.constant 1 : index
    %c0_13 = arith.constant 0 : index
    %21 = vector.load %arg3[%c1_12, %c0_13] : memref<8x128xf32, #tpu.memory_space<vmem>>, vector<1x32xf32>
    %cst_14 = arith.constant dense<0.000000e+00> : vector<32xf32>
    %22 = vector.multi_reduction <add>, %19, %cst_14 [1] : vector<32x32xf32> to vector<32xf32>
    %23 = vector.shape_cast %22 : vector<32xf32> to vector<32x1xf32>
    %cst_15 = arith.constant 3.200000e+01 : f32
    %24 = vector.broadcast %cst_15 : f32 to vector<32x1xf32>
    %25 = arith.divf %23, %24 : vector<32x1xf32>
    %26 = vector.broadcast %25 : vector<32x1xf32> to vector<32x32xf32>
    %27 = arith.subf %19, %26 : vector<32x32xf32>
    %28 = vector.broadcast %25 : vector<32x1xf32> to vector<32x32xf32>
    %29 = arith.subf %19, %28 : vector<32x32xf32>
    %30 = arith.mulf %27, %29 : vector<32x32xf32>
    %cst_16 = arith.constant dense<0.000000e+00> : vector<32xf32>
    %31 = vector.multi_reduction <add>, %30, %cst_16 [1] : vector<32x32xf32> to vector<32xf32>
    %32 = vector.shape_cast %31 : vector<32xf32> to vector<32x1xf32>
    %cst_17 = arith.constant 3.200000e+01 : f32
    %33 = vector.broadcast %cst_17 : f32 to vector<32x1xf32>
    %34 = arith.divf %32, %33 : vector<32x1xf32>
    %35 = vector.broadcast %25 : vector<32x1xf32> to vector<32x32xf32>
    %36 = arith.subf %19, %35 : vector<32x32xf32>
    %cst_18 = arith.constant 9.99999997E-7 : f32
    %37 = vector.broadcast %cst_18 : f32 to vector<32x1xf32>
    %38 = arith.addf %34, %37 : vector<32x1xf32>
    %39 = math.rsqrt %38 : vector<32x1xf32>
    %40 = vector.broadcast %39 : vector<32x1xf32> to vector<32x32xf32>
    %41 = arith.mulf %36, %40 : vector<32x32xf32>
    %42 = vector.broadcast %20 : vector<1x32xf32> to vector<32x32xf32>
    %43 = arith.mulf %41, %42 : vector<32x32xf32>
    %44 = vector.broadcast %21 : vector<1x32xf32> to vector<32x32xf32>
    %45 = arith.addf %43, %44 : vector<32x32xf32>
    %c0_19 = arith.constant 0 : index
    %c0_20 = arith.constant 0 : index
    %46 = vector.load %arg1[%c0_19, %c0_20] : memref<4x8xf32, #tpu.memory_space<vmem>>, vector<4x8xf32>
    %cst_21 = arith.constant 0.000000e+00 : f32
    %47 = vector.broadcast %cst_21 : f32 to vector<4x8xf32>
    %48 = arith.cmpf ogt, %46, %47 : vector<4x8xf32>
    %cst_22 = arith.constant 1.000000e+00 : f32
    %cst_23 = arith.constant 0.000000e+00 : f32
    %49 = vector.broadcast %cst_22 : f32 to vector<4x8xf32>
    %50 = vector.broadcast %cst_23 : f32 to vector<4x8xf32>
    %51 = arith.select %48, %49, %50 : vector<4x8xi1>, vector<4x8xf32>
    %cst_24 = arith.constant 1.000000e+00 : f32
    %52 = vector.broadcast %cst_24 : f32 to vector<4x8xf32>
    %53 = arith.subf %52, %51 : vector<4x8xf32>
    %cst_25 = arith.constant -1.000000e+04 : f32
    %54 = vector.broadcast %cst_25 : f32 to vector<4x8xf32>
    %55 = arith.mulf %53, %54 : vector<4x8xf32>
    %56 = vector.shape_cast %55 : vector<4x8xf32> to vector<4x1x8xf32>
    %c0_26 = arith.constant 0 : index
    %c0_27 = arith.constant 0 : index
    %c0_28 = arith.constant 0 : index
    %57 = vector.load %arg4[%c0_26, %c0_27, %c0_28] : memref<2x32x96xf32, #tpu.memory_space<vmem>>, vector<1x32x96xf32>
    %58 = vector.shape_cast %57 : vector<1x32x96xf32> to vector<32x96xf32>
    %cst_29 = arith.constant dense<0.000000e+00> : vector<32x96xf32>
    %59 = tpu.matmul %45, %58, %cst_29 {dimension_numbers = #tpu.dot_dimension_numbers<[1], [0], [0], [1], [0, 0, 1, 1], [], []>} : vector<32x32xf32>, vector<32x96xf32>, vector<32x96xf32> -> vector<32x96xf32>
    %c0_30 = arith.constant 0 : index
    %c0_31 = arith.constant 0 : index
    %c0_32 = arith.constant 0 : index
    %60 = vector.load %arg8[%c0_30, %c0_31, %c0_32] : memref<2x8x128xf32, #tpu.memory_space<vmem>>, vector<1x1x96xf32>
    %61 = vector.shape_cast %60 : vector<1x1x96xf32> to vector<1x96xf32>
    %62 = vector.broadcast %61 : vector<1x96xf32> to vector<32x96xf32>
    %63 = arith.addf %59, %62 : vector<32x96xf32>
    %c0_33 = arith.constant 0 : index
    %c1_34 = arith.constant 1 : index
    %c0_35 = arith.constant 0 : index
    %64 = vector.load %arg8[%c0_33, %c1_34, %c0_35] : memref<2x8x128xf32, #tpu.memory_space<vmem>>, vector<1x1x32xf32>
    %65 = vector.shape_cast %64 : vector<1x1x32xf32> to vector<1x32xf32>
    %66 = vector.extract_strided_slice %63 {offsets = [0, 0], sizes = [32, 16], strides = [1, 1]} : vector<32x96xf32> to vector<32x16xf32>
    %67 = vector.shape_cast %66 : vector<32x16xf32> to vector<4x8x16xf32>
    %68 = vector.extract_strided_slice %63 {offsets = [0, 32], sizes = [32, 16], strides = [1, 1]} : vector<32x96xf32> to vector<32x16xf32>
    %69 = vector.shape_cast %68 : vector<32x16xf32> to vector<4x8x16xf32>
    %70 = vector.extract_strided_slice %63 {offsets = [0, 64], sizes = [32, 16], strides = [1, 1]} : vector<32x96xf32> to vector<32x16xf32>
    %71 = vector.shape_cast %70 : vector<32x16xf32> to vector<4x8x16xf32>
    "tpu.trace_start"() <{level = 10 : i32, message = "bqd,bkd->bqk"}> : () -> ()
    %cst_36 = arith.constant dense<0.000000e+00> : vector<4x8x8xf32>
    %72 = tpu.matmul %67, %69, %cst_36 {dimension_numbers = #tpu.dot_dimension_numbers<[2], [2], [1], [1], [0, 0, 0, 1, 1, 1], [0], [0]>} : vector<4x8x16xf32>, vector<4x8x16xf32>, vector<4x8x8xf32> -> vector<4x8x8xf32>
    "tpu.trace_stop"() : () -> ()
    %73 = vector.broadcast %56 : vector<4x1x8xf32> to vector<4x8x8xf32>
    %74 = arith.addf %72, %73 : vector<4x8x8xf32>
    %cst_37 = arith.constant dense<0xFF800000> : vector<4x8xf32>
    %75 = vector.multi_reduction <maximumf>, %74, %cst_37 [2] : vector<4x8x8xf32> to vector<4x8xf32>
    %76 = vector.shape_cast %75 : vector<4x8xf32> to vector<4x8x1xf32>
    %77 = vector.broadcast %76 : vector<4x8x1xf32> to vector<4x8x8xf32>
    %78 = arith.subf %74, %77 : vector<4x8x8xf32>
    %79 = math.exp %78 : vector<4x8x8xf32>
    %cst_38 = arith.constant dense<0.000000e+00> : vector<4x8xf32>
    %80 = vector.multi_reduction <add>, %79, %cst_38 [2] : vector<4x8x8xf32> to vector<4x8xf32>
    %81 = vector.shape_cast %80 : vector<4x8xf32> to vector<4x8x1xf32>
    %82 = tpu.reciprocal %81 {approx = true} : vector<4x8x1xf32> -> vector<4x8x1xf32>
    %83 = vector.broadcast %82 : vector<4x8x1xf32> to vector<4x8x8xf32>
    %84 = arith.mulf %79, %83 : vector<4x8x8xf32>
    "tpu.trace_start"() <{level = 10 : i32, message = "bqk,bkd->bqd"}> : () -> ()
    %cst_39 = arith.constant dense<0.000000e+00> : vector<4x8x16xf32>
    %85 = tpu.matmul %84, %71, %cst_39 {dimension_numbers = #tpu.dot_dimension_numbers<[2], [1], [1], [2], [0, 0, 0, 1, 1, 2], [0], [0]>} : vector<4x8x8xf32>, vector<4x8x16xf32>, vector<4x8x16xf32> -> vector<4x8x16xf32>
    "tpu.trace_stop"() : () -> ()
    %86 = vector.shape_cast %85 : vector<4x8x16xf32> to vector<32x16xf32>
    %c0_40 = arith.constant 0 : index
    %c0_41 = arith.constant 0 : index
    %c0_42 = arith.constant 0 : index
    %87 = vector.load %arg5[%c0_40, %c0_41, %c0_42] : memref<2x32x32xf32, #tpu.memory_space<vmem>>, vector<1x16x32xf32>
    %88 = vector.shape_cast %87 : vector<1x16x32xf32> to vector<16x32xf32>
    %cst_43 = arith.constant dense<0.000000e+00> : vector<32x32xf32>
    %89 = tpu.matmul %86, %88, %cst_43 {dimension_numbers = #tpu.dot_dimension_numbers<[1], [0], [0], [1], [0, 0, 1, 1], [], []>} : vector<32x16xf32>, vector<16x32xf32>, vector<32x32xf32> -> vector<32x32xf32>
    %90 = vector.broadcast %65 : vector<1x32xf32> to vector<32x32xf32>
    %91 = arith.addf %90, %89 : vector<32x32xf32>
    %92 = vector.extract_strided_slice %63 {offsets = [0, 16], sizes = [32, 16], strides = [1, 1]} : vector<32x96xf32> to vector<32x16xf32>
    %93 = vector.shape_cast %92 : vector<32x16xf32> to vector<4x8x16xf32>
    %94 = vector.extract_strided_slice %63 {offsets = [0, 48], sizes = [32, 16], strides = [1, 1]} : vector<32x96xf32> to vector<32x16xf32>
    %95 = vector.shape_cast %94 : vector<32x16xf32> to vector<4x8x16xf32>
    %96 = vector.extract_strided_slice %63 {offsets = [0, 80], sizes = [32, 16], strides = [1, 1]} : vector<32x96xf32> to vector<32x16xf32>
    %97 = vector.shape_cast %96 : vector<32x16xf32> to vector<4x8x16xf32>
    "tpu.trace_start"() <{level = 10 : i32, message = "bqd,bkd->bqk"}> : () -> ()
    %cst_44 = arith.constant dense<0.000000e+00> : vector<4x8x8xf32>
    %98 = tpu.matmul %93, %95, %cst_44 {dimension_numbers = #tpu.dot_dimension_numbers<[2], [2], [1], [1], [0, 0, 0, 1, 1, 1], [0], [0]>} : vector<4x8x16xf32>, vector<4x8x16xf32>, vector<4x8x8xf32> -> vector<4x8x8xf32>
    "tpu.trace_stop"() : () -> ()
    %99 = vector.broadcast %56 : vector<4x1x8xf32> to vector<4x8x8xf32>
    %100 = arith.addf %98, %99 : vector<4x8x8xf32>
    %cst_45 = arith.constant dense<0xFF800000> : vector<4x8xf32>
    %101 = vector.multi_reduction <maximumf>, %100, %cst_45 [2] : vector<4x8x8xf32> to vector<4x8xf32>
    %102 = vector.shape_cast %101 : vector<4x8xf32> to vector<4x8x1xf32>
    %103 = vector.broadcast %102 : vector<4x8x1xf32> to vector<4x8x8xf32>
    %104 = arith.subf %100, %103 : vector<4x8x8xf32>
    %105 = math.exp %104 : vector<4x8x8xf32>
    %cst_46 = arith.constant dense<0.000000e+00> : vector<4x8xf32>
    %106 = vector.multi_reduction <add>, %105, %cst_46 [2] : vector<4x8x8xf32> to vector<4x8xf32>
    %107 = vector.shape_cast %106 : vector<4x8xf32> to vector<4x8x1xf32>
    %108 = tpu.reciprocal %107 {approx = true} : vector<4x8x1xf32> -> vector<4x8x1xf32>
    %109 = vector.broadcast %108 : vector<4x8x1xf32> to vector<4x8x8xf32>
    %110 = arith.mulf %105, %109 : vector<4x8x8xf32>
    "tpu.trace_start"() <{level = 10 : i32, message = "bqk,bkd->bqd"}> : () -> ()
    %cst_47 = arith.constant dense<0.000000e+00> : vector<4x8x16xf32>
    %111 = tpu.matmul %110, %97, %cst_47 {dimension_numbers = #tpu.dot_dimension_numbers<[2], [1], [1], [2], [0, 0, 0, 1, 1, 2], [0], [0]>} : vector<4x8x8xf32>, vector<4x8x16xf32>, vector<4x8x16xf32> -> vector<4x8x16xf32>
    "tpu.trace_stop"() : () -> ()
    %112 = vector.shape_cast %111 : vector<4x8x16xf32> to vector<32x16xf32>
    %c0_48 = arith.constant 0 : index
    %c16 = arith.constant 16 : index
    %c0_49 = arith.constant 0 : index
    %113 = vector.load %arg5[%c0_48, %c16, %c0_49] : memref<2x32x32xf32, #tpu.memory_space<vmem>>, vector<1x16x32xf32>
    %114 = vector.shape_cast %113 : vector<1x16x32xf32> to vector<16x32xf32>
    %cst_50 = arith.constant dense<0.000000e+00> : vector<32x32xf32>
    %115 = tpu.matmul %112, %114, %cst_50 {dimension_numbers = #tpu.dot_dimension_numbers<[1], [0], [0], [1], [0, 0, 1, 1], [], []>} : vector<32x16xf32>, vector<16x32xf32>, vector<32x32xf32> -> vector<32x32xf32>
    %116 = arith.addf %91, %115 : vector<32x32xf32>
    %117 = arith.addf %45, %116 : vector<32x32xf32>
    %c0_51 = arith.constant 0 : index
    %c4 = arith.constant 4 : index
    %c0_52 = arith.constant 0 : index
    %118 = vector.load %arg8[%c0_51, %c4, %c0_52] : memref<2x8x128xf32, #tpu.memory_space<vmem>>, vector<1x1x32xf32>
    %119 = vector.shape_cast %118 : vector<1x1x32xf32> to vector<1x32xf32>
    %c0_53 = arith.constant 0 : index
    %c5 = arith.constant 5 : index
    %c0_54 = arith.constant 0 : index
    %120 = vector.load %arg8[%c0_53, %c5, %c0_54] : memref<2x8x128xf32, #tpu.memory_space<vmem>>, vector<1x1x32xf32>
    %121 = vector.shape_cast %120 : vector<1x1x32xf32> to vector<1x32xf32>
    %cst_55 = arith.constant dense<0.000000e+00> : vector<32xf32>
    %122 = vector.multi_reduction <add>, %117, %cst_55 [1] : vector<32x32xf32> to vector<32xf32>
    %123 = vector.shape_cast %122 : vector<32xf32> to vector<32x1xf32>
    %cst_56 = arith.constant 3.200000e+01 : f32
    %124 = vector.broadcast %cst_56 : f32 to vector<32x1xf32>
    %125 = arith.divf %123, %124 : vector<32x1xf32>
    %126 = vector.broadcast %125 : vector<32x1xf32> to vector<32x32xf32>
    %127 = arith.subf %117, %126 : vector<32x32xf32>
    %128 = vector.broadcast %125 : vector<32x1xf32> to vector<32x32xf32>
    %129 = arith.subf %117, %128 : vector<32x32xf32>
    %130 = arith.mulf %127, %129 : vector<32x32xf32>
    %cst_57 = arith.constant dense<0.000000e+00> : vector<32xf32>
    %131 = vector.multi_reduction <add>, %130, %cst_57 [1] : vector<32x32xf32> to vector<32xf32>
    %132 = vector.shape_cast %131 : vector<32xf32> to vector<32x1xf32>
    %cst_58 = arith.constant 3.200000e+01 : f32
    %133 = vector.broadcast %cst_58 : f32 to vector<32x1xf32>
    %134 = arith.divf %132, %133 : vector<32x1xf32>
    %135 = vector.broadcast %125 : vector<32x1xf32> to vector<32x32xf32>
    %136 = arith.subf %117, %135 : vector<32x32xf32>
    %cst_59 = arith.constant 9.99999997E-7 : f32
    %137 = vector.broadcast %cst_59 : f32 to vector<32x1xf32>
    %138 = arith.addf %134, %137 : vector<32x1xf32>
    %139 = math.rsqrt %138 : vector<32x1xf32>
    %140 = vector.broadcast %139 : vector<32x1xf32> to vector<32x32xf32>
    %141 = arith.mulf %136, %140 : vector<32x32xf32>
    %142 = vector.broadcast %119 : vector<1x32xf32> to vector<32x32xf32>
    %143 = arith.mulf %141, %142 : vector<32x32xf32>
    %144 = vector.broadcast %121 : vector<1x32xf32> to vector<32x32xf32>
    %145 = arith.addf %143, %144 : vector<32x32xf32>
    %c0_60 = arith.constant 0 : index
    %c0_61 = arith.constant 0 : index
    %c0_62 = arith.constant 0 : index
    %146 = vector.load %arg6[%c0_60, %c0_61, %c0_62] : memref<2x32x64xf32, #tpu.memory_space<vmem>>, vector<1x32x64xf32>
    %147 = vector.shape_cast %146 : vector<1x32x64xf32> to vector<32x64xf32>
    %cst_63 = arith.constant dense<0.000000e+00> : vector<32x64xf32>
    %148 = tpu.matmul %145, %147, %cst_63 {dimension_numbers = #tpu.dot_dimension_numbers<[1], [0], [0], [1], [0, 0, 1, 1], [], []>} : vector<32x32xf32>, vector<32x64xf32>, vector<32x64xf32> -> vector<32x64xf32>
    %c0_64 = arith.constant 0 : index
    %c2_65 = arith.constant 2 : index
    %c0_66 = arith.constant 0 : index
    %149 = vector.load %arg8[%c0_64, %c2_65, %c0_66] : memref<2x8x128xf32, #tpu.memory_space<vmem>>, vector<1x1x64xf32>
    %150 = vector.shape_cast %149 : vector<1x1x64xf32> to vector<1x64xf32>
    %151 = vector.broadcast %150 : vector<1x64xf32> to vector<32x64xf32>
    %152 = arith.addf %148, %151 : vector<32x64xf32>
    %cst_67 = arith.constant 5.000000e-01 : f32
    %153 = vector.broadcast %cst_67 : f32 to vector<32x64xf32>
    %154 = arith.mulf %153, %152 : vector<32x64xf32>
    %cst_68 = arith.constant 4.471500e-02 : f32
    %155 = vector.broadcast %cst_68 : f32 to vector<32x64xf32>
    %156 = arith.mulf %155, %152 : vector<32x64xf32>
    %157 = arith.mulf %156, %152 : vector<32x64xf32>
    %158 = arith.mulf %157, %152 : vector<32x64xf32>
    %159 = arith.addf %152, %158 : vector<32x64xf32>
    %cst_69 = arith.constant 0.797884583 : f32
    %160 = vector.broadcast %cst_69 : f32 to vector<32x64xf32>
    %161 = arith.mulf %160, %159 : vector<32x64xf32>
    %162 = math.tanh %161 : vector<32x64xf32>
    %cst_70 = arith.constant 1.000000e+00 : f32
    %163 = vector.broadcast %cst_70 : f32 to vector<32x64xf32>
    %164 = arith.addf %163, %162 : vector<32x64xf32>
    %165 = arith.mulf %154, %164 : vector<32x64xf32>
    %c0_71 = arith.constant 0 : index
    %c0_72 = arith.constant 0 : index
    %c0_73 = arith.constant 0 : index
    %166 = vector.load %arg7[%c0_71, %c0_72, %c0_73] : memref<2x64x32xf32, #tpu.memory_space<vmem>>, vector<1x64x32xf32>
    %167 = vector.shape_cast %166 : vector<1x64x32xf32> to vector<64x32xf32>
    %cst_74 = arith.constant dense<0.000000e+00> : vector<32x32xf32>
    %168 = tpu.matmul %165, %167, %cst_74 {dimension_numbers = #tpu.dot_dimension_numbers<[1], [0], [0], [1], [0, 0, 1, 1], [], []>} : vector<32x64xf32>, vector<64x32xf32>, vector<32x32xf32> -> vector<32x32xf32>
    %c0_75 = arith.constant 0 : index
    %c3 = arith.constant 3 : index
    %c0_76 = arith.constant 0 : index
    %169 = vector.load %arg8[%c0_75, %c3, %c0_76] : memref<2x8x128xf32, #tpu.memory_space<vmem>>, vector<1x1x32xf32>
    %170 = vector.shape_cast %169 : vector<1x1x32xf32> to vector<1x32xf32>
    %171 = vector.broadcast %170 : vector<1x32xf32> to vector<32x32xf32>
    %172 = arith.addf %168, %171 : vector<32x32xf32>
    %173 = arith.addf %145, %172 : vector<32x32xf32>
    %c0_77 = arith.constant 0 : index
    %c6 = arith.constant 6 : index
    %c0_78 = arith.constant 0 : index
    %174 = vector.load %arg8[%c0_77, %c6, %c0_78] : memref<2x8x128xf32, #tpu.memory_space<vmem>>, vector<1x1x32xf32>
    %175 = vector.shape_cast %174 : vector<1x1x32xf32> to vector<1x32xf32>
    %c0_79 = arith.constant 0 : index
    %c7 = arith.constant 7 : index
    %c0_80 = arith.constant 0 : index
    %176 = vector.load %arg8[%c0_79, %c7, %c0_80] : memref<2x8x128xf32, #tpu.memory_space<vmem>>, vector<1x1x32xf32>
    %177 = vector.shape_cast %176 : vector<1x1x32xf32> to vector<1x32xf32>
    %cst_81 = arith.constant dense<0.000000e+00> : vector<32xf32>
    %178 = vector.multi_reduction <add>, %173, %cst_81 [1] : vector<32x32xf32> to vector<32xf32>
    %179 = vector.shape_cast %178 : vector<32xf32> to vector<32x1xf32>
    %cst_82 = arith.constant 3.200000e+01 : f32
    %180 = vector.broadcast %cst_82 : f32 to vector<32x1xf32>
    %181 = arith.divf %179, %180 : vector<32x1xf32>
    %182 = vector.broadcast %181 : vector<32x1xf32> to vector<32x32xf32>
    %183 = arith.subf %173, %182 : vector<32x32xf32>
    %184 = vector.broadcast %181 : vector<32x1xf32> to vector<32x32xf32>
    %185 = arith.subf %173, %184 : vector<32x32xf32>
    %186 = arith.mulf %183, %185 : vector<32x32xf32>
    %cst_83 = arith.constant dense<0.000000e+00> : vector<32xf32>
    %187 = vector.multi_reduction <add>, %186, %cst_83 [1] : vector<32x32xf32> to vector<32xf32>
    %188 = vector.shape_cast %187 : vector<32xf32> to vector<32x1xf32>
    %cst_84 = arith.constant 3.200000e+01 : f32
    %189 = vector.broadcast %cst_84 : f32 to vector<32x1xf32>
    %190 = arith.divf %188, %189 : vector<32x1xf32>
    %191 = vector.broadcast %181 : vector<32x1xf32> to vector<32x32xf32>
    %192 = arith.subf %173, %191 : vector<32x32xf32>
    %cst_85 = arith.constant 9.99999997E-7 : f32
    %193 = vector.broadcast %cst_85 : f32 to vector<32x1xf32>
    %194 = arith.addf %190, %193 : vector<32x1xf32>
    %195 = math.rsqrt %194 : vector<32x1xf32>
    %196 = vector.broadcast %195 : vector<32x1xf32> to vector<32x32xf32>
    %197 = arith.mulf %192, %196 : vector<32x32xf32>
    %198 = vector.broadcast %175 : vector<1x32xf32> to vector<32x32xf32>
    %199 = arith.mulf %197, %198 : vector<32x32xf32>
    %200 = vector.broadcast %177 : vector<1x32xf32> to vector<32x32xf32>
    %201 = arith.addf %199, %200 : vector<32x32xf32>
    %c1_86 = arith.constant 1 : index
    %c0_87 = arith.constant 0 : index
    %c0_88 = arith.constant 0 : index
    %202 = vector.load %arg4[%c1_86, %c0_87, %c0_88] : memref<2x32x96xf32, #tpu.memory_space<vmem>>, vector<1x32x96xf32>
    %203 = vector.shape_cast %202 : vector<1x32x96xf32> to vector<32x96xf32>
    %cst_89 = arith.constant dense<0.000000e+00> : vector<32x96xf32>
    %204 = tpu.matmul %201, %203, %cst_89 {dimension_numbers = #tpu.dot_dimension_numbers<[1], [0], [0], [1], [0, 0, 1, 1], [], []>} : vector<32x32xf32>, vector<32x96xf32>, vector<32x96xf32> -> vector<32x96xf32>
    %c1_90 = arith.constant 1 : index
    %c0_91 = arith.constant 0 : index
    %c0_92 = arith.constant 0 : index
    %205 = vector.load %arg8[%c1_90, %c0_91, %c0_92] : memref<2x8x128xf32, #tpu.memory_space<vmem>>, vector<1x1x96xf32>
    %206 = vector.shape_cast %205 : vector<1x1x96xf32> to vector<1x96xf32>
    %207 = vector.broadcast %206 : vector<1x96xf32> to vector<32x96xf32>
    %208 = arith.addf %204, %207 : vector<32x96xf32>
    %c1_93 = arith.constant 1 : index
    %c1_94 = arith.constant 1 : index
    %c0_95 = arith.constant 0 : index
    %209 = vector.load %arg8[%c1_93, %c1_94, %c0_95] : memref<2x8x128xf32, #tpu.memory_space<vmem>>, vector<1x1x32xf32>
    %210 = vector.shape_cast %209 : vector<1x1x32xf32> to vector<1x32xf32>
    %211 = vector.extract_strided_slice %208 {offsets = [0, 0], sizes = [32, 16], strides = [1, 1]} : vector<32x96xf32> to vector<32x16xf32>
    %212 = vector.shape_cast %211 : vector<32x16xf32> to vector<4x8x16xf32>
    %213 = vector.extract_strided_slice %208 {offsets = [0, 32], sizes = [32, 16], strides = [1, 1]} : vector<32x96xf32> to vector<32x16xf32>
    %214 = vector.shape_cast %213 : vector<32x16xf32> to vector<4x8x16xf32>
    %215 = vector.extract_strided_slice %208 {offsets = [0, 64], sizes = [32, 16], strides = [1, 1]} : vector<32x96xf32> to vector<32x16xf32>
    %216 = vector.shape_cast %215 : vector<32x16xf32> to vector<4x8x16xf32>
    "tpu.trace_start"() <{level = 10 : i32, message = "bqd,bkd->bqk"}> : () -> ()
    %cst_96 = arith.constant dense<0.000000e+00> : vector<4x8x8xf32>
    %217 = tpu.matmul %212, %214, %cst_96 {dimension_numbers = #tpu.dot_dimension_numbers<[2], [2], [1], [1], [0, 0, 0, 1, 1, 1], [0], [0]>} : vector<4x8x16xf32>, vector<4x8x16xf32>, vector<4x8x8xf32> -> vector<4x8x8xf32>
    "tpu.trace_stop"() : () -> ()
    %218 = vector.broadcast %56 : vector<4x1x8xf32> to vector<4x8x8xf32>
    %219 = arith.addf %217, %218 : vector<4x8x8xf32>
    %cst_97 = arith.constant dense<0xFF800000> : vector<4x8xf32>
    %220 = vector.multi_reduction <maximumf>, %219, %cst_97 [2] : vector<4x8x8xf32> to vector<4x8xf32>
    %221 = vector.shape_cast %220 : vector<4x8xf32> to vector<4x8x1xf32>
    %222 = vector.broadcast %221 : vector<4x8x1xf32> to vector<4x8x8xf32>
    %223 = arith.subf %219, %222 : vector<4x8x8xf32>
    %224 = math.exp %223 : vector<4x8x8xf32>
    %cst_98 = arith.constant dense<0.000000e+00> : vector<4x8xf32>
    %225 = vector.multi_reduction <add>, %224, %cst_98 [2] : vector<4x8x8xf32> to vector<4x8xf32>
    %226 = vector.shape_cast %225 : vector<4x8xf32> to vector<4x8x1xf32>
    %227 = tpu.reciprocal %226 {approx = true} : vector<4x8x1xf32> -> vector<4x8x1xf32>
    %228 = vector.broadcast %227 : vector<4x8x1xf32> to vector<4x8x8xf32>
    %229 = arith.mulf %224, %228 : vector<4x8x8xf32>
    "tpu.trace_start"() <{level = 10 : i32, message = "bqk,bkd->bqd"}> : () -> ()
    %cst_99 = arith.constant dense<0.000000e+00> : vector<4x8x16xf32>
    %230 = tpu.matmul %229, %216, %cst_99 {dimension_numbers = #tpu.dot_dimension_numbers<[2], [1], [1], [2], [0, 0, 0, 1, 1, 2], [0], [0]>} : vector<4x8x8xf32>, vector<4x8x16xf32>, vector<4x8x16xf32> -> vector<4x8x16xf32>
    "tpu.trace_stop"() : () -> ()
    %231 = vector.shape_cast %230 : vector<4x8x16xf32> to vector<32x16xf32>
    %c1_100 = arith.constant 1 : index
    %c0_101 = arith.constant 0 : index
    %c0_102 = arith.constant 0 : index
    %232 = vector.load %arg5[%c1_100, %c0_101, %c0_102] : memref<2x32x32xf32, #tpu.memory_space<vmem>>, vector<1x16x32xf32>
    %233 = vector.shape_cast %232 : vector<1x16x32xf32> to vector<16x32xf32>
    %cst_103 = arith.constant dense<0.000000e+00> : vector<32x32xf32>
    %234 = tpu.matmul %231, %233, %cst_103 {dimension_numbers = #tpu.dot_dimension_numbers<[1], [0], [0], [1], [0, 0, 1, 1], [], []>} : vector<32x16xf32>, vector<16x32xf32>, vector<32x32xf32> -> vector<32x32xf32>
    %235 = vector.broadcast %210 : vector<1x32xf32> to vector<32x32xf32>
    %236 = arith.addf %235, %234 : vector<32x32xf32>
    %237 = vector.extract_strided_slice %208 {offsets = [0, 16], sizes = [32, 16], strides = [1, 1]} : vector<32x96xf32> to vector<32x16xf32>
    %238 = vector.shape_cast %237 : vector<32x16xf32> to vector<4x8x16xf32>
    %239 = vector.extract_strided_slice %208 {offsets = [0, 48], sizes = [32, 16], strides = [1, 1]} : vector<32x96xf32> to vector<32x16xf32>
    %240 = vector.shape_cast %239 : vector<32x16xf32> to vector<4x8x16xf32>
    %241 = vector.extract_strided_slice %208 {offsets = [0, 80], sizes = [32, 16], strides = [1, 1]} : vector<32x96xf32> to vector<32x16xf32>
    %242 = vector.shape_cast %241 : vector<32x16xf32> to vector<4x8x16xf32>
    "tpu.trace_start"() <{level = 10 : i32, message = "bqd,bkd->bqk"}> : () -> ()
    %cst_104 = arith.constant dense<0.000000e+00> : vector<4x8x8xf32>
    %243 = tpu.matmul %238, %240, %cst_104 {dimension_numbers = #tpu.dot_dimension_numbers<[2], [2], [1], [1], [0, 0, 0, 1, 1, 1], [0], [0]>} : vector<4x8x16xf32>, vector<4x8x16xf32>, vector<4x8x8xf32> -> vector<4x8x8xf32>
    "tpu.trace_stop"() : () -> ()
    %244 = vector.broadcast %56 : vector<4x1x8xf32> to vector<4x8x8xf32>
    %245 = arith.addf %243, %244 : vector<4x8x8xf32>
    %cst_105 = arith.constant dense<0xFF800000> : vector<4x8xf32>
    %246 = vector.multi_reduction <maximumf>, %245, %cst_105 [2] : vector<4x8x8xf32> to vector<4x8xf32>
    %247 = vector.shape_cast %246 : vector<4x8xf32> to vector<4x8x1xf32>
    %248 = vector.broadcast %247 : vector<4x8x1xf32> to vector<4x8x8xf32>
    %249 = arith.subf %245, %248 : vector<4x8x8xf32>
    %250 = math.exp %249 : vector<4x8x8xf32>
    %cst_106 = arith.constant dense<0.000000e+00> : vector<4x8xf32>
    %251 = vector.multi_reduction <add>, %250, %cst_106 [2] : vector<4x8x8xf32> to vector<4x8xf32>
    %252 = vector.shape_cast %251 : vector<4x8xf32> to vector<4x8x1xf32>
    %253 = tpu.reciprocal %252 {approx = true} : vector<4x8x1xf32> -> vector<4x8x1xf32>
    %254 = vector.broadcast %253 : vector<4x8x1xf32> to vector<4x8x8xf32>
    %255 = arith.mulf %250, %254 : vector<4x8x8xf32>
    "tpu.trace_start"() <{level = 10 : i32, message = "bqk,bkd->bqd"}> : () -> ()
    %cst_107 = arith.constant dense<0.000000e+00> : vector<4x8x16xf32>
    %256 = tpu.matmul %255, %242, %cst_107 {dimension_numbers = #tpu.dot_dimension_numbers<[2], [1], [1], [2], [0, 0, 0, 1, 1, 2], [0], [0]>} : vector<4x8x8xf32>, vector<4x8x16xf32>, vector<4x8x16xf32> -> vector<4x8x16xf32>
    "tpu.trace_stop"() : () -> ()
    %257 = vector.shape_cast %256 : vector<4x8x16xf32> to vector<32x16xf32>
    %c1_108 = arith.constant 1 : index
    %c16_109 = arith.constant 16 : index
    %c0_110 = arith.constant 0 : index
    %258 = vector.load %arg5[%c1_108, %c16_109, %c0_110] : memref<2x32x32xf32, #tpu.memory_space<vmem>>, vector<1x16x32xf32>
    %259 = vector.shape_cast %258 : vector<1x16x32xf32> to vector<16x32xf32>
    %cst_111 = arith.constant dense<0.000000e+00> : vector<32x32xf32>
    %260 = tpu.matmul %257, %259, %cst_111 {dimension_numbers = #tpu.dot_dimension_numbers<[1], [0], [0], [1], [0, 0, 1, 1], [], []>} : vector<32x16xf32>, vector<16x32xf32>, vector<32x32xf32> -> vector<32x32xf32>
    %261 = arith.addf %236, %260 : vector<32x32xf32>
    %262 = arith.addf %201, %261 : vector<32x32xf32>
    %c1_112 = arith.constant 1 : index
    %c4_113 = arith.constant 4 : index
    %c0_114 = arith.constant 0 : index
    %263 = vector.load %arg8[%c1_112, %c4_113, %c0_114] : memref<2x8x128xf32, #tpu.memory_space<vmem>>, vector<1x1x32xf32>
    %264 = vector.shape_cast %263 : vector<1x1x32xf32> to vector<1x32xf32>
    %c1_115 = arith.constant 1 : index
    %c5_116 = arith.constant 5 : index
    %c0_117 = arith.constant 0 : index
    %265 = vector.load %arg8[%c1_115, %c5_116, %c0_117] : memref<2x8x128xf32, #tpu.memory_space<vmem>>, vector<1x1x32xf32>
    %266 = vector.shape_cast %265 : vector<1x1x32xf32> to vector<1x32xf32>
    %cst_118 = arith.constant dense<0.000000e+00> : vector<32xf32>
    %267 = vector.multi_reduction <add>, %262, %cst_118 [1] : vector<32x32xf32> to vector<32xf32>
    %268 = vector.shape_cast %267 : vector<32xf32> to vector<32x1xf32>
    %cst_119 = arith.constant 3.200000e+01 : f32
    %269 = vector.broadcast %cst_119 : f32 to vector<32x1xf32>
    %270 = arith.divf %268, %269 : vector<32x1xf32>
    %271 = vector.broadcast %270 : vector<32x1xf32> to vector<32x32xf32>
    %272 = arith.subf %262, %271 : vector<32x32xf32>
    %273 = vector.broadcast %270 : vector<32x1xf32> to vector<32x32xf32>
    %274 = arith.subf %262, %273 : vector<32x32xf32>
    %275 = arith.mulf %272, %274 : vector<32x32xf32>
    %cst_120 = arith.constant dense<0.000000e+00> : vector<32xf32>
    %276 = vector.multi_reduction <add>, %275, %cst_120 [1] : vector<32x32xf32> to vector<32xf32>
    %277 = vector.shape_cast %276 : vector<32xf32> to vector<32x1xf32>
    %cst_121 = arith.constant 3.200000e+01 : f32
    %278 = vector.broadcast %cst_121 : f32 to vector<32x1xf32>
    %279 = arith.divf %277, %278 : vector<32x1xf32>
    %280 = vector.broadcast %270 : vector<32x1xf32> to vector<32x32xf32>
    %281 = arith.subf %262, %280 : vector<32x32xf32>
    %cst_122 = arith.constant 9.99999997E-7 : f32
    %282 = vector.broadcast %cst_122 : f32 to vector<32x1xf32>
    %283 = arith.addf %279, %282 : vector<32x1xf32>
    %284 = math.rsqrt %283 : vector<32x1xf32>
    %285 = vector.broadcast %284 : vector<32x1xf32> to vector<32x32xf32>
    %286 = arith.mulf %281, %285 : vector<32x32xf32>
    %287 = vector.broadcast %264 : vector<1x32xf32> to vector<32x32xf32>
    %288 = arith.mulf %286, %287 : vector<32x32xf32>
    %289 = vector.broadcast %266 : vector<1x32xf32> to vector<32x32xf32>
    %290 = arith.addf %288, %289 : vector<32x32xf32>
    %c1_123 = arith.constant 1 : index
    %c0_124 = arith.constant 0 : index
    %c0_125 = arith.constant 0 : index
    %291 = vector.load %arg6[%c1_123, %c0_124, %c0_125] : memref<2x32x64xf32, #tpu.memory_space<vmem>>, vector<1x32x64xf32>
    %292 = vector.shape_cast %291 : vector<1x32x64xf32> to vector<32x64xf32>
    %cst_126 = arith.constant dense<0.000000e+00> : vector<32x64xf32>
    %293 = tpu.matmul %290, %292, %cst_126 {dimension_numbers = #tpu.dot_dimension_numbers<[1], [0], [0], [1], [0, 0, 1, 1], [], []>} : vector<32x32xf32>, vector<32x64xf32>, vector<32x64xf32> -> vector<32x64xf32>
    %c1_127 = arith.constant 1 : index
    %c2_128 = arith.constant 2 : index
    %c0_129 = arith.constant 0 : index
    %294 = vector.load %arg8[%c1_127, %c2_128, %c0_129] : memref<2x8x128xf32, #tpu.memory_space<vmem>>, vector<1x1x64xf32>
    %295 = vector.shape_cast %294 : vector<1x1x64xf32> to vector<1x64xf32>
    %296 = vector.broadcast %295 : vector<1x64xf32> to vector<32x64xf32>
    %297 = arith.addf %293, %296 : vector<32x64xf32>
    %cst_130 = arith.constant 5.000000e-01 : f32
    %298 = vector.broadcast %cst_130 : f32 to vector<32x64xf32>
    %299 = arith.mulf %298, %297 : vector<32x64xf32>
    %cst_131 = arith.constant 4.471500e-02 : f32
    %300 = vector.broadcast %cst_131 : f32 to vector<32x64xf32>
    %301 = arith.mulf %300, %297 : vector<32x64xf32>
    %302 = arith.mulf %301, %297 : vector<32x64xf32>
    %303 = arith.mulf %302, %297 : vector<32x64xf32>
    %304 = arith.addf %297, %303 : vector<32x64xf32>
    %cst_132 = arith.constant 0.797884583 : f32
    %305 = vector.broadcast %cst_132 : f32 to vector<32x64xf32>
    %306 = arith.mulf %305, %304 : vector<32x64xf32>
    %307 = math.tanh %306 : vector<32x64xf32>
    %cst_133 = arith.constant 1.000000e+00 : f32
    %308 = vector.broadcast %cst_133 : f32 to vector<32x64xf32>
    %309 = arith.addf %308, %307 : vector<32x64xf32>
    %310 = arith.mulf %299, %309 : vector<32x64xf32>
    %c1_134 = arith.constant 1 : index
    %c0_135 = arith.constant 0 : index
    %c0_136 = arith.constant 0 : index
    %311 = vector.load %arg7[%c1_134, %c0_135, %c0_136] : memref<2x64x32xf32, #tpu.memory_space<vmem>>, vector<1x64x32xf32>
    %312 = vector.shape_cast %311 : vector<1x64x32xf32> to vector<64x32xf32>
    %cst_137 = arith.constant dense<0.000000e+00> : vector<32x32xf32>
    %313 = tpu.matmul %310, %312, %cst_137 {dimension_numbers = #tpu.dot_dimension_numbers<[1], [0], [0], [1], [0, 0, 1, 1], [], []>} : vector<32x64xf32>, vector<64x32xf32>, vector<32x32xf32> -> vector<32x32xf32>
    %c1_138 = arith.constant 1 : index
    %c3_139 = arith.constant 3 : index
    %c0_140 = arith.constant 0 : index
    %314 = vector.load %arg8[%c1_138, %c3_139, %c0_140] : memref<2x8x128xf32, #tpu.memory_space<vmem>>, vector<1x1x32xf32>
    %315 = vector.shape_cast %314 : vector<1x1x32xf32> to vector<1x32xf32>
    %316 = vector.broadcast %315 : vector<1x32xf32> to vector<32x32xf32>
    %317 = arith.addf %313, %316 : vector<32x32xf32>
    %318 = arith.addf %290, %317 : vector<32x32xf32>
    %c1_141 = arith.constant 1 : index
    %c6_142 = arith.constant 6 : index
    %c0_143 = arith.constant 0 : index
    %319 = vector.load %arg8[%c1_141, %c6_142, %c0_143] : memref<2x8x128xf32, #tpu.memory_space<vmem>>, vector<1x1x32xf32>
    %320 = vector.shape_cast %319 : vector<1x1x32xf32> to vector<1x32xf32>
    %c1_144 = arith.constant 1 : index
    %c7_145 = arith.constant 7 : index
    %c0_146 = arith.constant 0 : index
    %321 = vector.load %arg8[%c1_144, %c7_145, %c0_146] : memref<2x8x128xf32, #tpu.memory_space<vmem>>, vector<1x1x32xf32>
    %322 = vector.shape_cast %321 : vector<1x1x32xf32> to vector<1x32xf32>
    %cst_147 = arith.constant dense<0.000000e+00> : vector<32xf32>
    %323 = vector.multi_reduction <add>, %318, %cst_147 [1] : vector<32x32xf32> to vector<32xf32>
    %324 = vector.shape_cast %323 : vector<32xf32> to vector<32x1xf32>
    %cst_148 = arith.constant 3.200000e+01 : f32
    %325 = vector.broadcast %cst_148 : f32 to vector<32x1xf32>
    %326 = arith.divf %324, %325 : vector<32x1xf32>
    %327 = vector.broadcast %326 : vector<32x1xf32> to vector<32x32xf32>
    %328 = arith.subf %318, %327 : vector<32x32xf32>
    %329 = vector.broadcast %326 : vector<32x1xf32> to vector<32x32xf32>
    %330 = arith.subf %318, %329 : vector<32x32xf32>
    %331 = arith.mulf %328, %330 : vector<32x32xf32>
    %cst_149 = arith.constant dense<0.000000e+00> : vector<32xf32>
    %332 = vector.multi_reduction <add>, %331, %cst_149 [1] : vector<32x32xf32> to vector<32xf32>
    %333 = vector.shape_cast %332 : vector<32xf32> to vector<32x1xf32>
    %cst_150 = arith.constant 3.200000e+01 : f32
    %334 = vector.broadcast %cst_150 : f32 to vector<32x1xf32>
    %335 = arith.divf %333, %334 : vector<32x1xf32>
    %336 = vector.broadcast %326 : vector<32x1xf32> to vector<32x32xf32>
    %337 = arith.subf %318, %336 : vector<32x32xf32>
    %cst_151 = arith.constant 9.99999997E-7 : f32
    %338 = vector.broadcast %cst_151 : f32 to vector<32x1xf32>
    %339 = arith.addf %335, %338 : vector<32x1xf32>
    %340 = math.rsqrt %339 : vector<32x1xf32>
    %341 = vector.broadcast %340 : vector<32x1xf32> to vector<32x32xf32>
    %342 = arith.mulf %337, %341 : vector<32x32xf32>
    %343 = vector.broadcast %320 : vector<1x32xf32> to vector<32x32xf32>
    %344 = arith.mulf %342, %343 : vector<32x32xf32>
    %345 = vector.broadcast %322 : vector<1x32xf32> to vector<32x32xf32>
    %346 = arith.addf %344, %345 : vector<32x32xf32>
    %347 = vector.shape_cast %46 : vector<4x8xf32> to vector<4x8x1xf32>
    %348 = vector.shape_cast %346 : vector<32x32xf32> to vector<4x8x32xf32>
    %349 = vector.broadcast %347 : vector<4x8x1xf32> to vector<4x8x32xf32>
    %350 = arith.mulf %348, %349 : vector<4x8x32xf32>
    %cst_152 = arith.constant dense<0.000000e+00> : vector<4x32xf32>
    %351 = vector.multi_reduction <add>, %350, %cst_152 [1] : vector<4x8x32xf32> to vector<4x32xf32>
    %cst_153 = arith.constant dense<0.000000e+00> : vector<4x1xf32>
    %352 = vector.multi_reduction <add>, %347, %cst_153 [1] : vector<4x8x1xf32> to vector<4x1xf32>
    %353 = tpu.reciprocal %352 {approx = true} : vector<4x1xf32> -> vector<4x1xf32>
    %354 = vector.broadcast %353 : vector<4x1xf32> to vector<4x32xf32>
    %355 = arith.mulf %351, %354 : vector<4x32xf32>
    %c0_154 = arith.constant 0 : index
    %c0_155 = arith.constant 0 : index
    %356 = vector.load %arg9[%c0_154, %c0_155] : memref<4x32xf32, #tpu.memory_space<vmem>>, vector<4x32xf32>
    tpu.vector_store %arg9[%c0_154, %c0_155], %355 {strides = array<i32>} : memref<4x32xf32, #tpu.memory_space<vmem>>, vector<4x32xf32>,
    return
  }
}

</mosaic_0001>

<bundles_post_ra>
// kernel: simcse_forward.1
= control target key start
LH: loop header
LB: loop body
LE: loop exit
PB: predicated region body
PF: predicated region fallthrough
CT: control target
= control target key end

     0   :  { %14 = vsyncpa [#allocation3], 0  ;;  %s6342_s0 = inlined_call_operand.vmem [shape: s32[3,32,1], index: 0, kind: input, shape index: {}]   ;;  %s6343_s1 = inlined_call_operand.vmem [shape: f32[4,8], index: 1, kind: input, shape index: {}]   ;;  %s6344_s2 = inlined_call_operand.hbm [shape: f32[128,32], index: 2, kind: input, shape index: {}]   ;;  %s6345_s3 = inlined_call_operand.vmem [shape: f32[8,128], index: 3, kind: input, shape index: {}]   ;;  %s6346_s4 = inlined_call_operand.hbm [shape: f32[2,32,96], index: 4, kind: input, shape index: {}]   ;;  %s6347_s5 = inlined_call_operand.hbm [shape: f32[2,32,32], index: 5, kind: input, shape index: {}]   ;;  %s6348_s6 = inlined_call_operand.hbm [shape: f32[2,32,64], index: 6, kind: input, shape index: {}]   ;;  %s6349_s7 = inlined_call_operand.vmem [shape: f32[2,64,32], index: 7, kind: input, shape index: {}]   ;;  %s6350_s8 = inlined_call_operand.vmem [shape: f32[2,8,128], index: 8, kind: input, shape index: {}]   ;;  %s6351_s9 = inlined_call_operand.vmem [shape: f32[4,32], index: 9, kind: output, shape index: {}]  }
   0x1   :  { %15 = vsyncpa [#allocation5], 0 }
   0x2   :  { %16 = vsyncpa [#allocation8], 0  ;;  %s5581_s30 = smov [#allocation4]   ;;  %s5582_s11 = smov [#allocation2]  }
   0x3   :  { %s40_s10 = sshll.u32 %s5581_s30, 4  ;;  %s26_s12 = sshll.u32 %s5582_s11, 4  ;;  %s41_s10 = int_to_ptr.vmem [resolvable:$true] %s40_s10  ;;  %s5647_s12 = int_to_ptr.vmem [resolvable:$true] %s26_s12 }
   0x4   :  { %s5487_s15 = scalar_lea.hbm %s6346_s4, 1024 }
   0x5   :  { %p5488_p0 = scmp.ne.s32.totalorder %s6346_s4, %s5487_s15  ;;  %p5491_p1 = scmp.lt.u32.totalorder %s5487_s15, %s6346_s4 }
   0x7   :  { %p5493_p2 = pnand %p5491_p1, %p5488_p0 }
   0x9   :  { %5496 = shalt.err (!%p5493_p2)
}
   0xa   :  { %s5497_s20 = scalar_lea.vmem %s41_s10, 1024  ;;  %p5502_p4 = scmp.lt.s32.totalorder %s41_s10, %s41_s10 }
   0xb   :  { %p5498_p3 = scmp.ne.s32.totalorder %s41_s10, %s5497_s20  ;;  %p5503_p5 = scmp.lt.s32.totalorder %s5497_s20, %s5497_s20 }
   0xd   :  { %p5504_p6 = por %p5503_p5, %p5502_p4 }
   0xf   :  { %p5505_p7 = pnand %p5504_p6, %p5498_p3 }
  0x11   :  { %5508 = shalt.err (!%p5505_p7)
}
  0x12   :  { %s5583_s21 = smov 128   ;;  %s5584_s22 = smov 8  }
  0x13   :  { %46 = dma.hbm_to_vmem [thread:$0]  %s6346_s4, 1024, %s41_s10, [#allocation5], %s5583_s21, %s5583_s21, %s5584_s22  }
  0x14   :  { %s5509_s27 = scalar_lea.hbm %s6344_s2, 2048 }
  0x15   :  { %p5510_p8 = scmp.ne.s32.totalorder %s6344_s2, %s5509_s27  ;;  %p5513_p9 = scmp.lt.u32.totalorder %s5509_s27, %s6344_s2 }
  0x17   :  { %p5515_p10 = pnand %p5513_p9, %p5510_p8 }
  0x19   :  { %5518 = shalt.err (!%p5515_p10)
}
  0x1a   :  { %s5519_s13 = scalar_lea.vmem %s5647_s12, 2048  ;;  %p5524_p12 = scmp.lt.s32.totalorder %s5647_s12, %s5647_s12 }
  0x1b   :  { %p5520_p11 = scmp.ne.s32.totalorder %s5647_s12, %s5519_s13  ;;  %p5525_p13 = scmp.lt.s32.totalorder %s5519_s13, %s5519_s13 }
  0x1d   :  { %p5526_p0 = por %p5525_p13, %p5524_p12 }
  0x1f   :  { %p5527_p1 = pnand %p5526_p0, %p5520_p11 }
  0x21   :  { %5530 = shalt.err (!%p5527_p1)
}
  0x22   :  { %32 = dma.hbm_to_vmem [thread:$0]  %s6344_s2, 2048, %s5647_s12, [#allocation3], %s5583_s21, %s5583_s21, %s5584_s22  }
  0x23   :  { %s5585_s14 = smov [#allocation6]   ;;  %s5586_s16 = smov [#allocation7]  }
  0x24   :  { %s52_s15 = sshll.u32 %s5585_s14, 4  ;;  %s64_s17 = sshll.u32 %s5586_s16, 4  ;;  %s53_s15 = int_to_ptr.vmem [resolvable:$true] %s52_s15  ;;  %s5684_s17 = int_to_ptr.vmem [resolvable:$true] %s64_s17 }
  0x25   :  { %s5531_s20 = scalar_lea.hbm %s6347_s5, 1024 }
  0x26   :  { %p5532_p2 = scmp.ne.s32.totalorder %s6347_s5, %s5531_s20  ;;  %p5535_p3 = scmp.lt.u32.totalorder %s5531_s20, %s6347_s5 }
  0x28   :  { %p5537_p4 = pnand %p5535_p3, %p5532_p2 }
  0x2a   :  { %5540 = shalt.err (!%p5537_p4)
}
  0x2b   :  { %s5541_s2 = scalar_lea.vmem %s53_s15, 1024  ;;  %p5546_p6 = scmp.lt.s32.totalorder %s53_s15, %s53_s15 }
  0x2c   :  { %p5542_p5 = scmp.ne.s32.totalorder %s53_s15, %s5541_s2  ;;  %p5547_p7 = scmp.lt.s32.totalorder %s5541_s2, %s5541_s2 }
  0x2e   :  { %p5548_p8 = por %p5547_p7, %p5546_p6 }
  0x30   :  { %p5549_p9 = pnand %p5548_p8, %p5542_p5 }
  0x32   :  { %5552 = shalt.err (!%p5549_p9)
}
  0x33   :  { %58 = dma.hbm_to_vmem [thread:$0]  %s6347_s5, 1024, %s53_s15, [#allocation5], %s5583_s21, %s5583_s21, %s5584_s22  }
  0x34   :  { %s5553_s30 = scalar_lea.hbm %s6348_s6, 1024 }
  0x35   :  { %p5554_p10 = scmp.ne.s32.totalorder %s6348_s6, %s5553_s30  ;;  %p5557_p11 = scmp.lt.u32.totalorder %s5553_s30, %s6348_s6 }
  0x37   :  { %p5559_p12 = pnand %p5557_p11, %p5554_p10 }
  0x39   :  { %5562 = shalt.err (!%p5559_p12)
}
  0x3a   :  { %s5563_s14 = scalar_lea.vmem %s5684_s17, 1024  ;;  %p5568_p0 = scmp.lt.s32.totalorder %s5684_s17, %s5684_s17 }
  0x3b   :  { %p5564_p13 = scmp.ne.s32.totalorder %s5684_s17, %s5563_s14  ;;  %p5569_p1 = scmp.lt.s32.totalorder %s5563_s14, %s5563_s14 }
  0x3d   :  { %p5570_p2 = por %p5569_p1, %p5568_p0 }
  0x3f   :  { %p5571_p3 = pnand %p5570_p2, %p5564_p13 }
  0x41   :  { %5574 = shalt.err (!%p5571_p3)
}
  0x42   :  { %70 = dma.hbm_to_vmem [thread:$0]  %s6348_s6, 1024, %s5684_s17, [#allocation8], %s5583_s21, %s5583_s21, %s5584_s22  }
  0x43   :  { %5575 = dma.done.wait [#allocation3], 2048  }
  0x44   :  { %5576 = vsyncadd [#allocation3], 4294965248 }
  0x45   :  { %5577 = dma.done.wait [#allocation5], 2048  }
  0x46   :  { %5578 = vsyncadd [#allocation5], 4294965248 }
  0x47   :  { %5579 = dma.done.wait [#allocation8], 1024  }
  0x48   :  { %5580 = vsyncadd [#allocation8], 4294966272  ;;  %v5587_v0 = vmov 0   ;;  %v90_v1 = vld [vmem:[%s6342_s0 + $0x8] sm:$0xff]  ;;  %v89_v2 = vld [vmem:[%s6342_s0] sm:$0xff]  ;;  %v87_v37 = vlaneseq  ;;  %v5588_v45 = vmov 1.0  }
  0x49   :  { %5357 = vset.pattern.permute.xlu1 %v5587_v0  ;;  %5356 = vset.pattern.permute.xlu0 %v5587_v0  ;;  %v4573_v3 = vld [vmem:[%s6342_s0 + $0x28] sm:$0xff]  ;;  %v4572_v4 = vld [vmem:[%s6342_s0 + $0x20] sm:$0xff]  ;;  %v165_v7 = vld [vmem:[#allocation2 + $0x10] sm:$0xff]  ;;  %s5591_s20 = smov 96   ;;  %s5593_s22 = smov 64  }
  0x4a   :  { %97 = vperm.xlu1 %5357, %v90_v1   ;;  %94 = vperm.xlu0 %5356, %v89_v2   ;;  %v163_v5 = vld [vmem:[#allocation2] sm:$0xff]  ;;  %v164_v6 = vld [vmem:[#allocation2 + $0x8] sm:$0xff]  ;;  %v166_v9 = vld [vmem:[#allocation2 + $0x18] sm:$0xff]  ;;  %v88_v40 = vand.u32 127, %v87_v37  ;;  %s5594_s17 = smov 112   ;;  %s5595_s23 = smov 80  }
  0x4b   :  { %v5208_v8 = vpack.c.bf16 %v164_v6, %v163_v5  ;;  %v4577_v10 = vld [vmem:[%s6342_s0 + $0x48] sm:$0xff]  ;;  %v4576_v11 = vld [vmem:[%s6342_s0 + $0x40] sm:$0xff]  ;;  %v5212_v12 = vpack.c.bf16 %v166_v9, %v165_v7  ;;  %v4574_v15 = vld [vmem:[%s6342_s0 + $0x30] sm:$0xff]  ;;  %s5596_s24 = smov 48  }
  0x4c   :  { %v167_v13 = vld [vmem:[#allocation2 + $0x20] sm:$0xff]  ;;  %v168_v14 = vld [vmem:[#allocation2 + $0x28] sm:$0xff]  ;;  %v91_v16 = vld [vmem:[%s6342_s0 + $0x10] sm:$0xff] }
  0x4d   :  { %5209 = vmatprep.subr.bf16.mxu0 %v5208_v8  ;;  %v5216_v17 = vpack.c.bf16 %v168_v14, %v167_v13  ;;  %v169_v18 = vld [vmem:[#allocation2 + $0x30] sm:$0xff]  ;;  %v170_v19 = vld [vmem:[#allocation2 + $0x38] sm:$0xff]  ;;  %v171_v23 = vld [vmem:[#allocation2 + $0x40] sm:$0xff] }
  0x4e   :  { %118 = vperm.xlu1 %5357, %v4573_v3   ;;  %115 = vperm.xlu0 %5356, %v4572_v4   ;;  %v4575_v20 = vld [vmem:[%s6342_s0 + $0x38] sm:$0xff]  ;;  %v5220_v22 = vpack.c.bf16 %v170_v19, %v169_v18  ;;  %v172_v24 = vld [vmem:[#allocation2 + $0x48] sm:$0xff]  ;;  %v4578_v26 = vld [vmem:[%s6342_s0 + $0x50] sm:$0xff] }
  0x4f   :  { %5211 = vmatpush3.bf16.msra.mxu0 %v5208_v8  ;;  %v92_v21 = vld [vmem:[%s6342_s0 + $0x18] sm:$0xff]  ;;  %v5224_v27 = vpack.c.bf16 %v172_v24, %v171_v23  ;;  %v173_v28 = vld [vmem:[#allocation2 + $0x50] sm:$0xff]  ;;  %v175_v31 = vld [vmem:[#allocation2 + $0x60] sm:$0xff] }
  0x50   :  { %5213 = vmatprep.subr.bf16.mxu0 %v5212_v12  ;;  %v4579_v25 = vld [vmem:[%s6342_s0 + $0x58] sm:$0xff]  ;;  %v176_v32 = vld [vmem:[#allocation2 + $0x68] sm:$0xff]  ;;  %v177_v34 = vld [vmem:[#allocation2 + $0x70] sm:$0xff] }
  0x51   :  { %v174_v29 = vld [vmem:[#allocation2 + $0x58] sm:$0xff]  ;;  %v5232_v33 = vpack.c.bf16 %v176_v32, %v175_v31  ;;  %v368_v19 = vld [vmem:[#allocation4 + $0x10] sm:$0xff]  ;;  %v4584_v31 = vld [vmem:[%s6345_s3] ss:$0 sm:$0xff] }
  0x52   :  { %143 = vperm.xlu1 %5357, %v4577_v10   ;;  %140 = vperm.xlu0 %5356, %v4576_v11   ;;  %v5228_v30 = vpack.c.bf16 %v174_v29, %v173_v28  ;;  %v178_v35 = vld [vmem:[#allocation2 + $0x78] sm:$0xff] }
  0x53   :  { %5215 = vmatpush3.bf16.msra.mxu0 %v5212_v12  ;;  %v5236_v36 = vpack.c.bf16 %v178_v35, %v177_v34 }
  0x54   :  { %5217 = vmatprep.subr.bf16.mxu0 %v5216_v17 }
  0x56   :  { %121 = vperm.xlu1 %5357, %v4574_v15   ;;  %100 = vperm.xlu0 %5356, %v91_v16   ;;  %v366_v16 = vld [vmem:[#allocation4] sm:$0xff] }
  0x57   :  { %5219 = vmatpush3.bf16.msra.mxu0 %v5216_v17  ;;  %v367_v17 = vld [vmem:[#allocation4 + $0x8] sm:$0xff] }
  0x58   :  { %5221 = vmatprep.subr.bf16.mxu0 %v5220_v22  ;;  %v5240_v18 = vpack.c.bf16 %v367_v17, %v366_v16 }
  0x5a   :  { %124 = vperm.xlu1 %5357, %v4575_v20   ;;  %103 = vperm.xlu0 %5356, %v92_v21   ;;  %v369_v20 = vld [vmem:[#allocation4 + $0x18] sm:$0xff] }
  0x5b   :  { %5223 = vmatpush3.bf16.msra.mxu0 %v5220_v22  ;;  %5320 = vmatprep.subr.bf16.mxu1 %v5240_v18  ;;  %v5244_v21 = vpack.c.bf16 %v369_v20, %v368_v19 }
  0x5c   :  { %5225 = vmatprep.subr.bf16.mxu0 %v5224_v27  ;;  %5322 = vmatpush3.bf16.msra.mxu1 %v5240_v18 }
  0x5d   :  { %5321 = vmatprep.subr.bf16.mxu1 %v5244_v21 }
  0x5e   :  { %149 = vperm.xlu1 %5357, %v4579_v25   ;;  %146 = vperm.xlu0 %5356, %v4578_v26  }
  0x5f   :  { %5227 = vmatpush3.bf16.msra.mxu0 %v5224_v27 }
  0x60   :  { %5229 = vmatprep.subr.bf16.mxu0 %v5228_v30  ;;  %5323 = vmatpush3.bf16.msra.mxu1 %v5244_v21 }
  0x63   :  { %5231 = vmatpush3.bf16.msra.mxu0 %v5228_v30 }
  0x64   :  { %5233 = vmatprep.subr.bf16.mxu0 %v5232_v33 }
  0x67   :  { %5235 = vmatpush3.bf16.msra.mxu0 %v5232_v33 }
  0x68   :  { %5237 = vmatprep.subr.bf16.mxu0 %v5236_v36 }
  0x6b   :  { %5239 = vmatpush3.bf16.msra.mxu0 %v5236_v36 }
  0x6c   :  { %5241 = vmatprep.subr.bf16.mxu0 %v5240_v18 }
  0xc9   :  { %v98_v38 = vpop.permute.xlu1 %97  ;;  %v95_v39 = vpop.permute.xlu0 %94 }
  0xca   :  { %vm106_vm2 = vcmp.eq.s32.totalorder %v88_v40, %v98_v38  ;;  %vm105_vm3 = vcmp.eq.s32.totalorder %v88_v40, %v95_v39  ;;  %v4585_v39 = vld [vmem:[%s6345_s3 + $0x1] ss:$0 sm:$0xff] }
  0xcd   :  { %v119_v41 = vpop.permute.xlu1 %118  ;;  %v116_v42 = vpop.permute.xlu0 %115 }
  0xce   :  { %vm127_vm0 = vcmp.eq.s32.totalorder %v88_v40, %v119_v41  ;;  %vm126_vm1 = vcmp.eq.s32.totalorder %v88_v40, %v116_v42 }
  0xcf   :  { %vm131_vm4 = vmor %vm106_vm2, %vm127_vm0 }
  0xd0   :  { %vm130_vm6 = vmor %vm105_vm3, %vm126_vm1 }
  0xd1   :  { %v144_v43 = vpop.permute.xlu1 %143  ;;  %v141_v44 = vpop.permute.xlu0 %140 }
  0xd2   :  { %vm152_vm5 = vcmp.eq.s32.totalorder %v88_v40, %v144_v43  ;;  %vm151_vm7 = vcmp.eq.s32.totalorder %v88_v40, %v141_v44 }
  0xd3   :  { %vm156_vm8 = vmor %vm131_vm4, %vm152_vm5  ;;  %vm266_vm4 = vcmask 261120   ;;  %vm5590_vm5 = vmmov 0  }
  0xd4   :  { %vm155_vm9 = vmor %vm130_vm6, %vm151_vm7  ;;  %vm496_vm6 = vcmask 130048  }
  0xd5   :  { %4902 = vmatprep.mubr.msk.f32.mxu0 %vm155_vm9, %v5588_v45  ;;  %v122_v46 = vpop.permute.xlu1 %121  ;;  %v101_v47 = vpop.permute.xlu0 %100  ;;  %vm2250_vm9 = vcmask 523264  }
  0xd6   :  { %4903 = vmatmul.mubr.msk.f32.vlgmr.msra.gmra.mrb[0].mxu0 %vm156_vm8, %v5588_v45  ;;  %vm128_vm10 = vcmp.eq.s32.totalorder %v88_v40, %v122_v46  ;;  %vm107_vm11 = vcmp.eq.s32.totalorder %v88_v40, %v101_v47  ;;  %vm802_vm8 = vcmask 64512  }
  0xd7   :  { %vm132_vm14 = vmor %vm107_vm11, %vm128_vm10  ;;  %5243 = vmatpush3.bf16.msra.mxu0 %v5240_v18  ;;  %vm4556_vm10 = vcmask 1041409   ;;  %vm4558_vm11 = vcmask 1042434  }
  0xd8   :  { %5245 = vmatprep.subr.bf16.mxu0 %v5244_v21 }
  0xd9   :  { %v125_v48 = vpop.permute.xlu1 %124  ;;  %v104_v49 = vpop.permute.xlu0 %103 }
  0xda   :  { %vm129_vm12 = vcmp.eq.s32.totalorder %v88_v40, %v125_v48  ;;  %vm108_vm13 = vcmp.eq.s32.totalorder %v88_v40, %v104_v49 }
  0xdb   :  { %vm133_vm15 = vmor %vm108_vm13, %vm129_vm12  ;;  %5247 = vmatpush3.bf16.msra.mxu0 %v5244_v21  ;;  %vm4560_vm12 = vcmask 1043459   ;;  %vm4563_vm13 = vcmask 257024  }
  0xdd   :  { %v150_v50 = vpop.permute.xlu1 %149  ;;  %v147_v51 = vpop.permute.xlu0 %146 }
  0xde   :  { %vm154_vm0 = vcmp.eq.s32.totalorder %v88_v40, %v150_v50  ;;  %vm153_vm1 = vcmp.eq.s32.totalorder %v88_v40, %v147_v51 }
  0xdf   :  { %vm158_vm2 = vmor %vm133_vm15, %vm154_vm0 }
  0xe0   :  { %vm157_vm3 = vmor %vm132_vm14, %vm153_vm1 }
  0xe1   :  { %4905 = vmatprep.mubr.msk.f32.mxu0 %vm157_vm3, %v5588_v45 }
  0xe2   :  { %4906 = vmatmul.mubr.msk.f32.gmra.mrb[2].mxu0 %vm158_vm2, %v5588_v45 }
 0x1a9   :  { %v4904_v52 = vpop.f32.mrb[0].mxu0 }
 0x1aa   :  { %v245_v53 = vpop.f32.mrb[1].mxu0  ;;  %v270_v54 = vsel %vm266_vm4, %v4904_v52, 0.0 }
 0x1ab   :  { %271 = vadd.xlane.f32.xlu1 %v270_v54  ;;  %v267_v55 = vsel %vm266_vm4, %v245_v53, 0.0  ;;  %v4586_v54 = vld [vmem:[%s6350_s8] ss:$0 sm:$0xff] }
 0x1ac   :  { %268 = vadd.xlane.f32.xlu0 %v267_v55 }
 0x1b5   :  { %v4907_v56 = vpop.f32.mrb[2].mxu0 }
 0x1b6   :  { %v255_v57 = vpop.f32.mrb[3].mxu0  ;;  %v276_v59 = vsel %vm266_vm4, %v4907_v56, 0.0 }
 0x1b7   :  { %v273_v58 = vsel %vm266_vm4, %v255_v57, 0.0 }
 0x1b8   :  { %274 = vadd.xlane.f32.xlu0 %v273_v58 }
 0x1bc   :  { %277 = vadd.xlane.f32.xlu0 %v276_v59 }
 0x238   :  { %v272_v60 = vpop.xlane.xlu1 %271 }
 0x239   :  { %v281_v61 = vmul.f32 0.03125, %v272_v60  ;;  %v269_v62 = vpop.xlane.xlu0 %268 }
 0x23a   :  { %v280_v63 = vmul.f32 0.03125, %v269_v62 }
 0x23b   :  { %v285_v0 = vsub.f32 %v4904_v52, %v281_v61 }
 0x23c   :  { %v284_v1 = vsub.f32 %v245_v53, %v280_v63  ;;  %v5589_v53 = vmov 0.0  }
 0x23d   :  { %v289_v2 = vmul.f32 %v285_v0, %v285_v0  ;;  %4922 = vmatprep.subr.mxu1 %v5589_v53  ;;  %4952 = vmatprep.subr.mxu0 %v5589_v53 }
 0x23e   :  { %v288_v3 = vmul.f32 %v284_v1, %v284_v1 }
 0x23f   :  { %v295_v4 = vsel %vm266_vm4, %v289_v2, 0.0 }
 0x240   :  { %296 = vadd.xlane.f32.xlu0 %v295_v4  ;;  %v292_v5 = vsel %vm266_vm4, %v288_v3, 0.0  ;;  %v336_v3 = vld [vmem:[%s6343_s1] sm:$0xf]  ;;  %v5592_v4 = vmov 1966171168  }
 0x241   :  { %293 = vadd.xlane.f32.xlu1 %v292_v5  ;;  %vm337_vm7 = vcmp.gt.f32.partialorder %v336_v3, 0.0  ;;  %v343_v5 = vunpack.c.l.s4 %v5592_v4 }
 0x245   :  { %v275_v6 = vpop.xlane.xlu0 %274 }
 0x246   :  { %v282_v7 = vmul.f32 0.03125, %v275_v6  ;;  %v338_v6 = vsel %vm337_vm7, 1.0, %v5589_v53 }
 0x248   :  { %v286_v8 = vsub.f32 %v255_v57, %v282_v7  ;;  %v339_v7 = vsub.f32 1.0, %v338_v6 }
 0x249   :  { %v278_v9 = vpop.xlane.xlu0 %277 }
 0x24a   :  { %v283_v10 = vmul.f32 0.03125, %v278_v9  ;;  %v290_v11 = vmul.f32 %v286_v8, %v286_v8  ;;  %v5842_v9 = vshrl.u32 %v87_v37, 7 }
 0x24c   :  { %v287_v12 = vsub.f32 %v4907_v56, %v283_v10  ;;  %v298_v13 = vsel %vm266_vm4, %v290_v11, 0.0  ;;  %v340_v10 = vmul.f32 -10000.0, %v339_v7 }
 0x24d   :  { %299 = vadd.xlane.f32.xlu1 %v298_v13 }
 0x24e   :  { %v291_v14 = vmul.f32 %v287_v12, %v287_v12 }
 0x250   :  { %v301_v15 = vsel %vm266_vm4, %v291_v14, 0.0  ;;  %v5846_v14 = vsub.s32 0, %v5842_v9 }
 0x251   :  { %302 = vadd.xlane.f32.xlu0 %v301_v15 }
 0x2cd   :  { %v297_v22 = vpop.xlane.xlu0 %296 }
 0x2ce   :  { %v305_v23 = vmul.f32 0.03125, %v297_v22  ;;  %v294_v24 = vpop.xlane.xlu1 %293 }
 0x2cf   :  { %v304_v25 = vmul.f32 0.03125, %v294_v24 }
 0x2d0   :  { %v309_v26 = vadd.f32 1e-06, %v305_v23 }
 0x2d1   :  { %v308_v27 = vadd.f32 1e-06, %v304_v25 }
 0x2d2   :  { %5358 = vrsqrt.f32 %v309_v26 }
 0x2d3   :  { %5360 = vrsqrt.f32 %v308_v27 }
 0x2da   :  { %v300_v28 = vpop.xlane.xlu1 %299 }
 0x2db   :  { %v306_v29 = vmul.f32 0.03125, %v300_v28 }
 0x2dc   :  { %v5359_v30 = vpop.eup %5358 }
 0x2dd   :  { %v5361_v32 = vpop.eup %5360  ;;  %v317_v33 = vmul.f32 %v5359_v30, %v285_v0  ;;  %v310_v34 = vadd.f32 1e-06, %v306_v29 }
 0x2de   :  { %v303_v35 = vpop.xlane.xlu0 %302  ;;  %v316_v36 = vmul.f32 %v5361_v32, %v284_v1 }
 0x2df   :  { %5362 = vrsqrt.f32 %v310_v34  ;;  %v307_v38 = vmul.f32 0.03125, %v303_v35  ;;  %v325_v40 = vmul.f32 %v4584_v31, %v317_v33 }
 0x2e0   :  { %v324_v41 = vmul.f32 %v4584_v31, %v316_v36 }
 0x2e1   :  { %v311_v42 = vadd.f32 1e-06, %v307_v38  ;;  %v5774_v44 = vadd.f32 %v4585_v39, %v325_v40 }
 0x2e2   :  { %v5772_v43 = vadd.f32 %v4585_v39, %v324_v41 }
 0x2e3   :  { %5364 = vrsqrt.f32 %v311_v42 }
 0x2e4   :  { %4916 = vmatprep.mubr.msk.f32.mxu0 %vm266_vm4, %v5772_v43 }
 0x2e5   :  { %4917 = vmatmul.mubr.msk.f32.vlgmr.msra.gmra.mrb[4].mxu0 %vm266_vm4, %v5774_v44 }
 0x2e6   :  { %4954 = vmatprep.mubr.msk.f32.mxu0 %vm5590_vm5, %v5589_v53 }
 0x2e9   :  { %v5363_v45 = vpop.eup %5362 }
 0x2ea   :  { %v318_v46 = vmul.f32 %v5363_v45, %v286_v8  ;;  %v344_v8 = vunpack.c.0.s8 %v343_v5 }
 0x2ec   :  { %v326_v47 = vmul.f32 %v4584_v31, %v318_v46  ;;  %v347_v11 = vsub.s32 %v344_v8, %v5842_v9 }
 0x2ed   :  { %v5365_v48 = vpop.eup %5364 }
 0x2ee   :  { %v5780_v49 = vadd.f32 %v4585_v39, %v326_v47  ;;  %v319_v50 = vmul.f32 %v5365_v48, %v287_v12  ;;  %v348_v12 = vrot.slane %v340_v10, %v347_v11 }
 0x2f0   :  { %4919 = vmatprep.mubr.msk.f32.mxu1 %vm266_vm4, %v5780_v49  ;;  %v327_v51 = vmul.f32 %v4584_v31, %v319_v50  ;;  %v356_v13 = vrot.slane %v348_v12, %v347_v11  ;;  %v349_v15 = vcombine.high %v348_v12, %v348_v12 }
 0x2f2   :  { %v5784_v52 = vadd.f32 %v4585_v39, %v327_v51  ;;  %v5849_v16 = vrot.slane %v356_v13, %v5846_v14  ;;  %v363_v17 = vrot.slane %v349_v15, %v347_v11  ;;  %v364_v26 = vcombine.high %v356_v13, %v356_v13 }
 0x2f4   :  { %4920 = vmatmul.mubr.msk.f32.vlgmr.msra.gmra.mrb[0].mxu1 %vm266_vm4, %v5784_v52  ;;  %v5853_v37 = vrot.slane %v363_v17, %v5846_v14  ;;  %v5859_v27 = vrot.slane %v364_v26, %v5846_v14  ;;  %v365_v28 = vcombine.high %v363_v17, %v363_v17 }
 0x2f5   :  { %4924 = vmatprep.mubr.msk.f32.mxu1 %vm5590_vm5, %v5589_v53 }
 0x2f6   :  { %v5863_v32 = vrot.slane %v365_v28, %v5846_v14 }
 0x3b8   :  { %v4918_v55 = vpop.f32.mrb[4].mxu0 }
 0x3b9   :  { %v5797_v56 = vadd.f32 %v4918_v55, %v4586_v54  ;;  %v453_v57 = vpop.f32.mrb[5].mxu0 }
 0x3ba   :  { %v5799_v58 = vadd.f32 %v4586_v54, %v453_v57 }
 0x3bb   :  { %572 = vrot.lane.b32.xlu0 %v5797_v56, %s5591_s20 }
 0x3bc   :  { %494 = vrot.lane.b32.xlu1 %v5799_v58, %s5591_s20 }
 0x3c7   :  { %v4921_v59 = vpop.f32.mrb[0].mxu1 }
 0x3c8   :  { %v463_v60 = vpop.f32.mrb[1].mxu1  ;;  %v5809_v62 = vadd.f32 %v4921_v59, %v4586_v54 }
 0x3c9   :  { %v5805_v61 = vadd.f32 %v4586_v54, %v463_v60 }
 0x3cb   :  { %649 = vrot.lane.b32.xlu1 %v5805_v61, %s5591_s20 }
 0x3cf   :  { %726 = vrot.lane.b32.xlu1 %v5809_v62, %s5591_s20 }
 0x42d   :  { %v573_v0 = vpop.permute.xlu0 %572 }
 0x42e   :  { %v495_v63 = vpop.permute.xlu1 %494 }
 0x42f   :  { %4923 = vmatpush3.xpose.msk.msra.mxu1 %vm496_vm6, %v495_v63 }
 0x430   :  { %4927 = vmatprep.subr.mxu1 %v5589_v53 }
 0x432   :  { %4925 = vmatmul.mubr.msk.f32.vlgmr.msra.gmra.mrb[2].mxu1 %vm496_vm6, %v5799_v58 }
 0x433   :  { %4928 = vmatpush3.xpose.msk.msra.mxu1 %vm496_vm6, %v573_v0  ;;  %4929 = vmatprep.mubr.msk.f32.mxu1 %vm5590_vm5, %v5589_v53 }
 0x434   :  { %4932 = vmatprep.subr.mxu1 %v5589_v53 }
 0x436   :  { %4930 = vmatmul.mubr.msk.f32.vlgmr.msra.gmra.mrb[4].mxu1 %vm496_vm6, %v5797_v56 }
 0x437   :  { %4934 = vmatprep.mubr.msk.f32.mxu1 %vm5590_vm5, %v5589_v53 }
 0x43d   :  { %v650_v1 = vpop.permute.xlu1 %649 }
 0x43e   :  { %4933 = vmatpush3.xpose.msk.msra.mxu1 %vm496_vm6, %v650_v1 }
 0x43f   :  { %4937 = vmatprep.subr.mxu1 %v5589_v53 }
 0x441   :  { %v727_v2 = vpop.permute.xlu1 %726  ;;  %4935 = vmatmul.mubr.msk.f32.vlgmr.msra.gmra.mrb[6].mxu1 %vm496_vm6, %v5805_v61 }
 0x442   :  { %4938 = vmatpush3.xpose.msk.msra.mxu1 %vm496_vm6, %v727_v2  ;;  %4939 = vmatprep.mubr.msk.f32.mxu1 %vm5590_vm5, %v5589_v53 }
 0x443   :  { %4942 = vmatprep.subr.mxu1 %v5589_v53 }
 0x445   :  { %4940 = vmatmul.mubr.msk.f32.vlgmr.msra.gmra.mrb[8].mxu1 %vm496_vm6, %v5809_v62 }
 0x446   :  { %4944 = vmatprep.mubr.msk.f32.mxu1 %vm5590_vm5, %v5589_v53 }
 0x505   :  { %v567_v18 = vpop.f32.mrb[2].mxu1 }
 0x506   :  { %v568_v19 = vadd.f32 %v567_v18, %v5849_v16  ;;  %v4926_v20 = vpop.f32.mrb[3].mxu1 }
 0x508   :  { %v803_v21 = vsel %vm802_vm8, %v568_v19, -inf }
 0x509   :  { %804 = vmax.xlane.f32.xlu0 %v803_v21  ;;  %v644_v22 = vpop.f32.mrb[4].mxu1 }
 0x50a   :  { %v645_v23 = vadd.f32 %v644_v22, %v5853_v37  ;;  %v4931_v24 = vpop.f32.mrb[5].mxu1 }
 0x50c   :  { %v806_v25 = vsel %vm802_vm8, %v645_v23, -inf }
 0x50d   :  { %807 = vmax.xlane.f32.xlu1 %v806_v25 }
 0x514   :  { %v721_v29 = vpop.f32.mrb[6].mxu1 }
 0x515   :  { %v722_v30 = vadd.f32 %v721_v29, %v5859_v27  ;;  %v4936_v31 = vpop.f32.mrb[7].mxu1 }
 0x516   :  { %v1152_v31 = vld [vmem:[#allocation6 + $0x8] sm:$0xff] }
 0x517   :  { %v809_v33 = vsel %vm802_vm8, %v722_v30, -inf }
 0x518   :  { %810 = vmax.xlane.f32.xlu0 %v809_v33  ;;  %v798_v34 = vpop.f32.mrb[8].mxu1 }
 0x519   :  { %v799_v35 = vadd.f32 %v798_v34, %v5863_v32  ;;  %v4941_v36 = vpop.f32.mrb[9].mxu1 }
 0x51b   :  { %v812_v38 = vsel %vm802_vm8, %v799_v35, -inf }
 0x51c   :  { %813 = vmax.xlane.f32.xlu0 %v812_v38 }
 0x51e   :  { %847 = vrot.lane.b32.xlu1 %v5799_v58, %s5593_s22 }
 0x596   :  { %v805_v39 = vpop.xlane.xlu0 %804 }
 0x597   :  { %v815_v40 = vsub.f32 %v568_v19, %v805_v39 }
 0x599   :  { %v819_v41 = vmul.f32 1.442695, %v815_v40 }
 0x59a   :  { %v808_v42 = vpop.xlane.xlu1 %807 }
 0x59b   :  { %5366 = vpow2.f32 %v819_v41  ;;  %v816_v45 = vsub.f32 %v645_v23, %v808_v42 }
 0x59d   :  { %v821_v46 = vmul.f32 1.442695, %v816_v45 }
 0x59e   :  { %v848_v47 = vpop.permute.xlu1 %847 }
 0x59f   :  { %5368 = vpow2.f32 %v821_v46  ;;  %4943 = vmatpush3.msra.mxu1 %v848_v47 }
 0x5a0   :  { %4947 = vmatprep.subr.mxu1 %v5589_v53 }
 0x5a5   :  { %v5367_v48 = vpop.eup %5366  ;;  %v811_v50 = vpop.xlane.xlu0 %810 }
 0x5a6   :  { %v817_v51 = vsub.f32 %v722_v30, %v811_v50  ;;  %v827_v54 = vsel %vm802_vm8, %v5367_v48, 0.0  ;;  %v1151_v30 = vld [vmem:[#allocation6] sm:$0xff] }
 0x5a7   :  { %828 = vadd.xlane.f32.xlu1 %v827_v54  ;;  %v5248_v33 = vpack.c.bf16 %v1152_v31, %v1151_v30 }
 0x5a8   :  { %v823_v55 = vmul.f32 1.442695, %v817_v51 }
 0x5a9   :  { %v5369_v57 = vpop.eup %5368  ;;  %v814_v59 = vpop.xlane.xlu0 %813 }
 0x5aa   :  { %5370 = vpow2.f32 %v823_v55  ;;  %v818_v60 = vsub.f32 %v799_v35, %v814_v59  ;;  %v830_v63 = vsel %vm802_vm8, %v5369_v57, 0.0 }
 0x5ab   :  { %831 = vadd.xlane.f32.xlu0 %v830_v63 }
 0x5ac   :  { %v825_v0 = vmul.f32 1.442695, %v818_v60 }
 0x5ae   :  { %5372 = vpow2.f32 %v825_v0 }
 0x5b4   :  { %v5371_v1 = vpop.eup %5370 }
 0x5b5   :  { %v833_v2 = vsel %vm802_vm8, %v5371_v1, 0.0 }
 0x5b6   :  { %834 = vadd.xlane.f32.xlu1 %v833_v2 }
 0x5b8   :  { %v5373_v3 = vpop.eup %5372 }
 0x5b9   :  { %v836_v4 = vsel %vm802_vm8, %v5373_v3, 0.0 }
 0x5ba   :  { %837 = vadd.xlane.f32.xlu0 %v836_v4 }
 0x5c7   :  { %999 = vrot.lane.b32.xlu1 %v5805_v61, %s5593_s22 }
 0x5cb   :  { %1075 = vrot.lane.b32.xlu1 %v5809_v62, %s5593_s22 }
 0x5cf   :  { %1258 = vrot.lane.b32.xlu1 %v5799_v58, %s5594_s17 }
 0x5d0   :  { %923 = vrot.lane.b32.xlu0 %v5797_v56, %s5593_s22 }
 0x5d3   :  { %1336 = vrot.lane.b32.xlu1 %v5797_v56, %s5594_s17 }
 0x5d4   :  { %1260 = vrot.lane.b32.xlu0 %v5799_v58, %s5595_s23 }
 0x5d7   :  { %1494 = vrot.lane.b32.xlu1 %v5809_v62, %s5595_s23 }
 0x5d8   :  { %1338 = vrot.lane.b32.xlu0 %v5797_v56, %s5595_s23 }
 0x5db   :  { %1492 = vrot.lane.b32.xlu1 %v5809_v62, %s5594_s17 }
 0x5dc   :  { %1416 = vrot.lane.b32.xlu0 %v5805_v61, %s5595_s23 }
 0x5e0   :  { %1414 = vrot.lane.b32.xlu0 %v5805_v61, %s5594_s17 }
 0x634   :  { %v829_v5 = vpop.xlane.xlu1 %828 }
 0x635   :  { %5374 = vrcp.f32 %v829_v5 }
 0x638   :  { %v832_v6 = vpop.xlane.xlu0 %831 }
 0x639   :  { %5376 = vrcp.f32 %v832_v6 }
 0x63f   :  { %v5375_v7 = vpop.eup %5374 }
 0x640   :  { %v843_v8 = vmul.f32 %v5375_v7, %v5367_v48 }
 0x642   :  { %4945 = vmatmul.mubr.msk.f32.vlgmr.msra.gmra.mrb[10].mxu1 %vm802_vm8, %v843_v8 }
 0x643   :  { %v835_v10 = vpop.xlane.xlu1 %834  ;;  %4949 = vmatprep.mubr.msk.f32.mxu1 %vm5590_vm5, %v5589_v53  ;;  %v5377_v13 = vpop.eup %5376 }
 0x644   :  { %5378 = vrcp.f32 %v835_v10  ;;  %v844_v15 = vmul.f32 %v5377_v13, %v5369_v57 }
 0x647   :  { %v1000_v11 = vpop.permute.xlu1 %999  ;;  %v838_v12 = vpop.xlane.xlu0 %837 }
 0x648   :  { %5380 = vrcp.f32 %v838_v12  ;;  %4953 = vmatpush3.msra.mxu0 %v1000_v11 }
 0x649   :  { %5249 = vmatprep.subr.bf16.mxu0 %v5248_v33 }
 0x64b   :  { %v1076_v17 = vpop.permute.xlu1 %1075  ;;  %v924_v18 = vpop.permute.xlu0 %923 }
 0x64c   :  { %4948 = vmatpush3.msra.mxu1 %v924_v18 }
 0x64d   :  { %4950 = vmatmul.mubr.msk.f32.vlgmr.msra.gmra.mrb[12].mxu1 %vm802_vm8, %v844_v15  ;;  %4957 = vmatprep.subr.mxu1 %v5589_v53 }
 0x64e   :  { %v5379_v19 = vpop.eup %5378  ;;  %4958 = vmatpush3.msra.mxu1 %v1076_v17  ;;  %4959 = vmatprep.mubr.msk.f32.mxu1 %vm5590_vm5, %v5589_v53 }
 0x64f   :  { %v845_v20 = vmul.f32 %v5379_v19, %v5371_v1  ;;  %v1259_v21 = vpop.permute.xlu1 %1258  ;;  %4972 = vmatprep.subr.mxu1 %v5589_v53  ;;  %v1261_v24 = vpop.permute.xlu0 %1260 }
 0x651   :  { %4955 = vmatmul.mubr.msk.f32.vlgmr.msra.gmra.mrb[6].mxu0 %vm802_vm8, %v845_v20 }
 0x652   :  { %v5381_v22 = vpop.eup %5380  ;;  %5251 = vmatpush3.bf16.msra.mxu0 %v5248_v33 }
 0x653   :  { %v846_v23 = vmul.f32 %v5381_v22, %v5373_v3  ;;  %v1337_v25 = vpop.permute.xlu1 %1336  ;;  %v1339_v26 = vpop.permute.xlu0 %1338  ;;  %4982 = vmatprep.subr.mxu0 %v5589_v53 }
 0x655   :  { %4960 = vmatmul.mubr.msk.f32.vlgmr.msra.gmra.mrb[14].mxu1 %vm802_vm8, %v846_v23 }
 0x656   :  { %4973 = vmatpush3.xpose.msk.msra.mxu1 %vm496_vm6, %v1261_v24  ;;  %4974 = vmatprep.mubr.msk.f32.mxu1 %vm5590_vm5, %v5589_v53 }
 0x657   :  { %4977 = vmatprep.subr.mxu1 %v5589_v53  ;;  %v1495_v28 = vpop.permute.xlu1 %1494  ;;  %v1417_v38 = vpop.permute.xlu0 %1416 }
 0x659   :  { %4975 = vmatmul.mubr.msk.f32.vlgmr.msra.gmra.mrb[16].mxu1 %vm496_vm6, %v1259_v21 }
 0x65a   :  { %4978 = vmatpush3.xpose.msk.msra.mxu1 %vm496_vm6, %v1339_v26  ;;  %4979 = vmatprep.mubr.msk.f32.mxu1 %vm5590_vm5, %v5589_v53 }
 0x65b   :  { %4987 = vmatprep.subr.mxu1 %v5589_v53  ;;  %v1493_v29 = vpop.permute.xlu1 %1492  ;;  %v1415_v46 = vpop.permute.xlu0 %1414 }
 0x65d   :  { %4980 = vmatmul.mubr.msk.f32.vlgmr.msra.gmra.mrb[18].mxu1 %vm496_vm6, %v1337_v25 }
 0x65e   :  { %4988 = vmatpush3.xpose.msk.msra.mxu1 %vm496_vm6, %v1495_v28  ;;  %4989 = vmatprep.mubr.msk.f32.mxu1 %vm5590_vm5, %v5589_v53 }
 0x65f   :  { %4997 = vmatprep.subr.mxu1 %v5589_v53 }
 0x661   :  { %4990 = vmatmul.mubr.msk.f32.vlgmr.msra.gmra.mrb[20].mxu1 %vm496_vm6, %v1493_v29 }
 0x662   :  { %4999 = vmatprep.mubr.msk.f32.mxu1 %vm5590_vm5, %v5589_v53 }
 0x715   :  { %v919_v34 = vpop.f32.mrb[10].mxu1 }
 0x716   :  { %v4946_v35 = vpop.f32.mrb[11].mxu1  ;;  %4966 = vmatprep.mubr.msk.f32.mxu0 %vm496_vm6, %v919_v34  ;;  %v1918_v34 = vld [vmem:[#allocation6 + $0x10] sm:$0xff] }
 0x717   :  { %v1919_v35 = vld [vmem:[#allocation6 + $0x18] sm:$0xff] }
 0x720   :  { %v995_v36 = vpop.f32.mrb[12].mxu1 }
 0x721   :  { %v4951_v39 = vpop.f32.mrb[13].mxu1  ;;  %4967 = vmatmul.mubr.msk.f32.vlgmr.msra.gmra.mrb[8].mxu0 %vm496_vm6, %v995_v36  ;;  %v5252_v36 = vpack.c.bf16 %v1919_v35, %v1918_v34 }
 0x722   :  { %4983 = vmatpush3.xpose.msk.msra.mxu0 %vm496_vm6, %v1417_v38 }
 0x723   :  { %4992 = vmatprep.subr.mxu0 %v5589_v53 }
 0x724   :  { %v1071_v40 = vpop.f32.mrb[6].mxu0 }
 0x725   :  { %v4956_v41 = vpop.f32.mrb[7].mxu0  ;;  %4969 = vmatprep.mubr.msk.f32.mxu0 %vm496_vm6, %v1071_v40 }
 0x728   :  { %v1147_v42 = vpop.f32.mrb[14].mxu1 }
 0x729   :  { %v4961_v45 = vpop.f32.mrb[15].mxu1  ;;  %4970 = vmatmul.mubr.msk.f32.gmra.mrb[10].mxu0 %vm496_vm6, %v1147_v42 }
 0x72a   :  { %4984 = vmatprep.mubr.msk.f32.mxu0 %vm5590_vm5, %v5589_v53 }
 0x72c   :  { %v1332_v47 = vpop.f32.mrb[16].mxu1 }
 0x72d   :  { %v1333_v48 = vadd.f32 %v1332_v47, %v5849_v16  ;;  %v4976_v50 = vpop.f32.mrb[17].mxu1  ;;  %4985 = vmatmul.mubr.msk.f32.vlgmr.msra.gmra.mrb[12].mxu0 %vm496_vm6, %v1415_v46 }
 0x72e   :  { %4994 = vmatprep.mubr.msk.f32.mxu0 %vm5590_vm5, %v5589_v53 }
 0x72f   :  { %v1570_v51 = vsel %vm802_vm8, %v1333_v48, -inf }
 0x730   :  { %1571 = vmax.xlane.f32.xlu0 %v1570_v51  ;;  %v1410_v54 = vpop.f32.mrb[18].mxu1 }
 0x731   :  { %v1411_v55 = vadd.f32 %v1410_v54, %v5853_v37  ;;  %v4981_v57 = vpop.f32.mrb[19].mxu1 }
 0x733   :  { %v1573_v59 = vsel %vm802_vm8, %v1411_v55, -inf }
 0x734   :  { %1574 = vmax.xlane.f32.xlu1 %v1573_v59  ;;  %v1566_v60 = vpop.f32.mrb[20].mxu1 }
 0x735   :  { %v4991_v63 = vpop.f32.mrb[21].mxu1  ;;  %v1567_v12 = vadd.f32 %v1566_v60, %v5863_v32 }
 0x737   :  { %v1579_v15 = vsel %vm802_vm8, %v1567_v12, -inf }
 0x7bd   :  { %v1572_v0 = vpop.xlane.xlu0 %1571 }
 0x7be   :  { %v1582_v1 = vsub.f32 %v1333_v48, %v1572_v0  ;;  %v4607_v0 = vld [vmem:[%s6350_s8 + $0x1] ss:$0 sm:$0xff] }
 0x7c0   :  { %v1586_v2 = vmul.f32 1.442695, %v1582_v1 }
 0x7c1   :  { %v1575_v5 = vpop.xlane.xlu1 %1574 }
 0x7c2   :  { %5382 = vpow2.f32 %v1586_v2  ;;  %v1583_v6 = vsub.f32 %v1411_v55, %v1575_v5 }
 0x7c4   :  { %v1588_v7 = vmul.f32 1.442695, %v1583_v6 }
 0x7c6   :  { %5384 = vpow2.f32 %v1588_v7 }
 0x7cc   :  { %v5383_v3 = vpop.eup %5382 }
 0x7cd   :  { %v1594_v4 = vsel %vm802_vm8, %v5383_v3, 0.0 }
 0x7ce   :  { %1595 = vadd.xlane.f32.xlu1 %v1594_v4 }
 0x7d0   :  { %v5385_v17 = vpop.eup %5384 }
 0x7df   :  { %1614 = vrot.lane.b32.xlu1 %v5799_v58, %s5596_s24  ;;  %v1597_v58 = vsel %vm802_vm8, %v5385_v17, 0.0 }
 0x7e3   :  { %1766 = vrot.lane.b32.xlu1 %v5805_v61, %s5596_s24 }
 0x800   :  { %v1488_v8 = vpop.f32.mrb[12].mxu0 }
 0x801   :  { %v1489_v10 = vadd.f32 %v1488_v8, %v5859_v27  ;;  %v4986_v11 = vpop.f32.mrb[13].mxu0 }
 0x803   :  { %v1576_v13 = vsel %vm802_vm8, %v1489_v10, -inf }
 0x804   :  { %1577 = vmax.xlane.f32.xlu0 %v1576_v13 }
 0x808   :  { %1580 = vmax.xlane.f32.xlu0 %v1579_v15 }
 0x80c   :  { %1598 = vadd.xlane.f32.xlu0 %v1597_v58 }
 0x85b   :  { %v1596_v61 = vpop.xlane.xlu1 %1595 }
 0x85c   :  { %5386 = vrcp.f32 %v1596_v61 }
 0x85f   :  { %v1615_v18 = vpop.permute.xlu1 %1614 }
 0x860   :  { %4993 = vmatpush3.msra.mxu0 %v1615_v18 }
 0x861   :  { %5002 = vmatprep.subr.mxu0 %v5589_v53 }
 0x863   :  { %v1767_v21 = vpop.permute.xlu1 %1766 }
 0x866   :  { %v5387_v19 = vpop.eup %5386 }
 0x867   :  { %v1610_v20 = vmul.f32 %v5387_v19, %v5383_v3 }
 0x869   :  { %4995 = vmatmul.mubr.msk.f32.vlgmr.msra.gmra.mrb[14].mxu0 %vm802_vm8, %v1610_v20 }
 0x86a   :  { %5003 = vmatpush3.msra.mxu0 %v1767_v21  ;;  %5004 = vmatprep.mubr.msk.f32.mxu0 %vm5590_vm5, %v5589_v53 }
 0x86b   :  { %5253 = vmatprep.subr.bf16.mxu0 %v5252_v36 }
 0x891   :  { %v1578_v22 = vpop.xlane.xlu0 %1577 }
 0x892   :  { %v1584_v23 = vsub.f32 %v1489_v10, %v1578_v22 }
 0x894   :  { %v1590_v24 = vmul.f32 1.442695, %v1584_v23 }
 0x895   :  { %v1581_v25 = vpop.xlane.xlu0 %1580 }
 0x896   :  { %5388 = vpow2.f32 %v1590_v24  ;;  %v1585_v26 = vsub.f32 %v1567_v12, %v1581_v25 }
 0x898   :  { %v1592_v28 = vmul.f32 1.442695, %v1585_v26 }
 0x899   :  { %v1599_v38 = vpop.xlane.xlu0 %1598 }
 0x89a   :  { %5390 = vpow2.f32 %v1592_v28 }
 0x89b   :  { %5392 = vrcp.f32 %v1599_v38  ;;  %v2096_v38 = vld [vmem:[#allocation7 + $0x8] sm:$0xff] }
 0x8a0   :  { %v5389_v29 = vpop.eup %5388 }
 0x8a1   :  { %v1600_v30 = vsel %vm802_vm8, %v5389_v29, 0.0 }
 0x8a2   :  { %1601 = vadd.xlane.f32.xlu1 %v1600_v30 }
 0x8a4   :  { %v5391_v31 = vpop.eup %5390 }
 0x8a5   :  { %v1603_v33 = vsel %vm802_vm8, %v5391_v31, 0.0  ;;  %v5393_v41 = vpop.eup %5392 }
 0x8a6   :  { %1604 = vadd.xlane.f32.xlu0 %v1603_v33  ;;  %v1611_v42 = vmul.f32 %v5393_v41, %v5385_v17  ;;  %v2098_v41 = vld [vmem:[#allocation7 + $0x18] sm:$0xff] }
 0x8b3   :  { %1842 = vrot.lane.b32.xlu1 %v5809_v62, %s5596_s24 }
 0x8bc   :  { %1690 = vrot.lane.b32.xlu0 %v5797_v56, %s5596_s24 }
 0x92f   :  { %v1602_v39 = vpop.xlane.xlu1 %1601 }
 0x930   :  { %5394 = vrcp.f32 %v1602_v39 }
 0x933   :  { %v1605_v40 = vpop.xlane.xlu0 %1604  ;;  %v1843_v46 = vpop.permute.xlu1 %1842 }
 0x934   :  { %5396 = vrcp.f32 %v1605_v40  ;;  %v2097_v40 = vld [vmem:[#allocation7 + $0x10] sm:$0xff] }
 0x937   :  { %v1691_v45 = vpop.permute.xlu0 %1690 }
 0x938   :  { %4998 = vmatpush3.msra.mxu1 %v1691_v45 }
 0x939   :  { %5000 = vmatmul.mubr.msk.f32.vlgmr.msra.gmra.mrb[22].mxu1 %vm802_vm8, %v1611_v42  ;;  %5007 = vmatprep.subr.mxu1 %v5589_v53  ;;  %v5260_v42 = vpack.c.bf16 %v2098_v41, %v2097_v40 }
 0x93a   :  { %v5395_v56 = vpop.eup %5394  ;;  %5008 = vmatpush3.msra.mxu1 %v1843_v46  ;;  %5009 = vmatprep.mubr.msk.f32.mxu1 %vm5590_vm5, %v5589_v53 }
 0x93b   :  { %v1612_v62 = vmul.f32 %v5395_v56, %v5389_v29 }
 0x93c   :  { %v1686_v47 = vpop.f32.mrb[14].mxu0 }
 0x93d   :  { %v4996_v48 = vpop.f32.mrb[15].mxu0  ;;  %5005 = vmatmul.mubr.msk.f32.vlgmr.msra.gmra.mrb[16].mxu0 %vm802_vm8, %v1612_v62 }
 0x93e   :  { %v5397_v50 = vpop.eup %5396  ;;  %5016 = vmatprep.mubr.msk.f32.mxu0 %vm496_vm6, %v1686_v47  ;;  %5255 = vmatpush3.bf16.msra.mxu0 %v5252_v36  ;;  %v2095_v36 = vld [vmem:[#allocation7] sm:$0xff] }
 0x93f   :  { %v1613_v51 = vmul.f32 %v5397_v50, %v5391_v31  ;;  %v5256_v39 = vpack.c.bf16 %v2096_v38, %v2095_v36 }
 0x941   :  { %5010 = vmatmul.mubr.msk.f32.vlgmr.msra.gmra.mrb[24].mxu1 %vm802_vm8, %v1613_v51  ;;  %5257 = vmatprep.subr.bf16.mxu1 %v5256_v39 }
 0x942   :  { %5259 = vmatpush3.bf16.msra.mxu1 %v5256_v39 }
 0x943   :  { %5261 = vmatprep.subr.bf16.mxu1 %v5260_v42 }
 0x946   :  { %5263 = vmatpush3.bf16.msra.mxu1 %v5260_v42 }
 0xa0c   :  { %v1762_v54 = vpop.f32.mrb[22].mxu1 }
 0xa0d   :  { %v5001_v55 = vpop.f32.mrb[23].mxu1  ;;  %5017 = vmatmul.mubr.msk.f32.vlgmr.msra.gmra.mrb[8].mxu0 %vm496_vm6, %v1762_v54 }
 0xa10   :  { %v1838_v57 = vpop.f32.mrb[16].mxu0 }
 0xa11   :  { %v5006_v59 = vpop.f32.mrb[17].mxu0  ;;  %5019 = vmatprep.mubr.msk.f32.mxu0 %vm496_vm6, %v1838_v57 }
 0xa14   :  { %v1914_v60 = vpop.f32.mrb[24].mxu1 }
 0xa15   :  { %v5011_v63 = vpop.f32.mrb[25].mxu1  ;;  %5020 = vmatmul.mubr.msk.f32.gmra.mrb[10].mxu0 %vm496_vm6, %v1914_v60  ;;  %v4624_v60 = vld [vmem:[%s6350_s8 + $0x4] ss:$0 sm:$0xff] }
 0xae0   :  { %v5018_v1 = vpop.f32.mrb[8].mxu0 }
 0xae1   :  { %v5324_v2 = vadd.f32 %v5018_v1, %v4607_v0  ;;  %v1998_v3 = vpop.f32.mrb[9].mxu0 }
 0xae2   :  { %v5325_v4 = vadd.f32 %v4607_v0, %v1998_v3  ;;  %v4625_v3 = vld [vmem:[%s6350_s8 + $0x5] ss:$0 sm:$0xff] }
 0xae3   :  { %v2022_v5 = vadd.f32 %v5324_v2, %v5774_v44 }
 0xae4   :  { %v2021_v6 = vadd.f32 %v5325_v4, %v5772_v43 }
 0xae5   :  { %v2030_v7 = vsel %vm266_vm4, %v2022_v5, 0.0 }
 0xae6   :  { %2031 = vadd.xlane.f32.xlu1 %v2030_v7  ;;  %v2027_v8 = vsel %vm266_vm4, %v2021_v6, 0.0 }
 0xae7   :  { %2028 = vadd.xlane.f32.xlu0 %v2027_v8 }
 0xae8   :  { %v5021_v10 = vpop.f32.mrb[10].mxu0 }
 0xae9   :  { %v2008_v11 = vpop.f32.mrb[11].mxu0  ;;  %v5326_v12 = vadd.f32 %v5021_v10, %v4607_v0 }
 0xaea   :  { %v5327_v13 = vadd.f32 %v4607_v0, %v2008_v11 }
 0xaeb   :  { %v2024_v58 = vadd.f32 %v5326_v12, %v5784_v52 }
 0xaec   :  { %v2023_v15 = vadd.f32 %v5327_v13, %v5780_v49 }
 0xaed   :  { %v2036_v44 = vsel %vm266_vm4, %v2024_v58, 0.0 }
 0xaee   :  { %v2033_v17 = vsel %vm266_vm4, %v2023_v15, 0.0 }
 0xaef   :  { %2034 = vadd.xlane.f32.xlu0 %v2033_v17 }
 0xaf3   :  { %2037 = vadd.xlane.f32.xlu0 %v2036_v44  ;;  %v2237_v44 = vld [vmem:[%s6349_s7] sm:$0xff] }
 0xb73   :  { %v2032_v43 = vpop.xlane.xlu1 %2031 }
 0xb74   :  { %v2040_v61 = vmul.f32 0.03125, %v2032_v43  ;;  %v2029_v18 = vpop.xlane.xlu0 %2028  ;;  %v2238_v43 = vld [vmem:[%s6349_s7 + $0x8] sm:$0xff] }
 0xb75   :  { %v2039_v19 = vmul.f32 0.03125, %v2029_v18  ;;  %v2239_v18 = vld [vmem:[%s6349_s7 + $0x10] sm:$0xff] }
 0xb76   :  { %v2044_v20 = vsub.f32 %v2022_v5, %v2040_v61  ;;  %v5264_v61 = vpack.c.bf16 %v2238_v43, %v2237_v44 }
 0xb77   :  { %v2043_v21 = vsub.f32 %v2021_v6, %v2039_v19  ;;  %v2240_v19 = vld [vmem:[%s6349_s7 + $0x18] sm:$0xff] }
 0xb78   :  { %v2048_v22 = vmul.f32 %v2044_v20, %v2044_v20  ;;  %5265 = vmatprep.subr.bf16.mxu0 %v5264_v61 }
 0xb79   :  { %v2047_v23 = vmul.f32 %v2043_v21, %v2043_v21  ;;  %5267 = vmatpush3.bf16.msra.mxu0 %v5264_v61 }
 0xb7a   :  { %v2054_v24 = vsel %vm266_vm4, %v2048_v22, 0.0  ;;  %v2242_v22 = vld [vmem:[%s6349_s7 + $0x28] sm:$0xff] }
 0xb7b   :  { %2055 = vadd.xlane.f32.xlu0 %v2054_v24  ;;  %v2051_v49 = vsel %vm266_vm4, %v2047_v23, 0.0  ;;  %v2243_v24 = vld [vmem:[%s6349_s7 + $0x30] sm:$0xff] }
 0xb7c   :  { %2052 = vadd.xlane.f32.xlu1 %v2051_v49  ;;  %v2035_v25 = vpop.xlane.xlu0 %2034  ;;  %v2244_v49 = vld [vmem:[%s6349_s7 + $0x38] sm:$0xff] }
 0xb7d   :  { %v2041_v52 = vmul.f32 0.03125, %v2035_v25  ;;  %v5276_v25 = vpack.c.bf16 %v2244_v49, %v2243_v24 }
 0xb7f   :  { %v2045_v26 = vsub.f32 %v2023_v15, %v2041_v52  ;;  %v4626_v52 = vld [vmem:[%s6350_s8 + $0x2] ss:$0 sm:$0xff] }
 0xb80   :  { %v2038_v28 = vpop.xlane.xlu0 %2037 }
 0xb81   :  { %v2042_v29 = vmul.f32 0.03125, %v2038_v28  ;;  %v2049_v30 = vmul.f32 %v2045_v26, %v2045_v26 }
 0xb83   :  { %v2046_v31 = vsub.f32 %v2024_v58, %v2042_v29  ;;  %v2057_v33 = vsel %vm266_vm4, %v2049_v30, 0.0 }
 0xb84   :  { %2058 = vadd.xlane.f32.xlu1 %v2057_v33 }
 0xb85   :  { %v2050_v34 = vmul.f32 %v2046_v31, %v2046_v31 }
 0xb87   :  { %v2060_v35 = vsel %vm266_vm4, %v2050_v34, 0.0 }
 0xb88   :  { %2061 = vadd.xlane.f32.xlu0 %v2060_v35 }
 0xc08   :  { %v2056_v45 = vpop.xlane.xlu0 %2055 }
 0xc09   :  { %v2064_v46 = vmul.f32 0.03125, %v2056_v45  ;;  %v2053_v56 = vpop.xlane.xlu1 %2052 }
 0xc0a   :  { %v2063_v62 = vmul.f32 0.03125, %v2053_v56 }
 0xc0b   :  { %v2068_v47 = vadd.f32 1e-06, %v2064_v46 }
 0xc0c   :  { %v2067_v48 = vadd.f32 1e-06, %v2063_v62 }
 0xc0d   :  { %5398 = vrsqrt.f32 %v2068_v47 }
 0xc0e   :  { %5400 = vrsqrt.f32 %v2067_v48 }
 0xc11   :  { %v2059_v50 = vpop.xlane.xlu1 %2058 }
 0xc12   :  { %v2065_v51 = vmul.f32 0.03125, %v2059_v50 }
 0xc14   :  { %v2069_v54 = vadd.f32 1e-06, %v2065_v51 }
 0xc15   :  { %v2062_v55 = vpop.xlane.xlu0 %2061 }
 0xc16   :  { %5402 = vrsqrt.f32 %v2069_v54  ;;  %v2066_v57 = vmul.f32 0.03125, %v2062_v55 }
 0xc17   :  { %v5399_v59 = vpop.eup %5398 }
 0xc18   :  { %v5401_v63 = vpop.eup %5400  ;;  %v2076_v0 = vmul.f32 %v5399_v59, %v2044_v20  ;;  %v2070_v1 = vadd.f32 1e-06, %v2066_v57  ;;  %v5268_v20 = vpack.c.bf16 %v2240_v19, %v2239_v18  ;;  %v4631_v19 = vld [vmem:[%s6350_s8 + $0x3] ss:$0 sm:$0xff] }
 0xc19   :  { %v2075_v2 = vmul.f32 %v5401_v63, %v2043_v21  ;;  %v2241_v21 = vld [vmem:[%s6349_s7 + $0x20] sm:$0xff] }
 0xc1a   :  { %5404 = vrsqrt.f32 %v2070_v1  ;;  %v2084_v4 = vmul.f32 %v4624_v60, %v2076_v0  ;;  %5269 = vmatprep.subr.bf16.mxu0 %v5268_v20  ;;  %v5272_v23 = vpack.c.bf16 %v2242_v22, %v2241_v21 }
 0xc1b   :  { %v2083_v5 = vmul.f32 %v4624_v60, %v2075_v2  ;;  %5271 = vmatpush3.bf16.msra.mxu0 %v5268_v20 }
 0xc1c   :  { %v5993_v7 = vadd.f32 %v4625_v3, %v2084_v4  ;;  %5273 = vmatprep.subr.bf16.mxu0 %v5272_v23 }
 0xc1d   :  { %v5991_v6 = vadd.f32 %v4625_v3, %v2083_v5 }
 0xc1f   :  { %5030 = vmatprep.mubr.msk.f32.mxu1 %vm266_vm4, %v5991_v6  ;;  %5275 = vmatpush3.bf16.msra.mxu0 %v5272_v23 }
 0xc20   :  { %v5403_v8 = vpop.eup %5402  ;;  %5031 = vmatmul.mubr.msk.f32.vlgmr.msra.gmra.mrb[26].mxu1 %vm266_vm4, %v5993_v7  ;;  %5277 = vmatprep.subr.bf16.mxu0 %v5276_v25 }
 0xc21   :  { %v2077_v10 = vmul.f32 %v5403_v8, %v2045_v26 }
 0xc23   :  { %v2085_v11 = vmul.f32 %v4624_v60, %v2077_v10  ;;  %5279 = vmatpush3.bf16.msra.mxu0 %v5276_v25 }
 0xc24   :  { %v5405_v12 = vpop.eup %5404  ;;  %5077 = vmatprep.subr.mxu0 %v5589_v53 }
 0xc25   :  { %v5999_v13 = vadd.f32 %v4625_v3, %v2085_v11  ;;  %v2078_v15 = vmul.f32 %v5405_v12, %v2046_v31 }
 0xc27   :  { %5033 = vmatprep.mubr.msk.f32.mxu1 %vm266_vm4, %v5999_v13  ;;  %v2086_v17 = vmul.f32 %v4624_v60, %v2078_v15 }
 0xc29   :  { %v6003_v58 = vadd.f32 %v4625_v3, %v2086_v17 }
 0xc2b   :  { %5034 = vmatmul.mubr.msk.f32.gmra.mrb[28].mxu1 %vm266_vm4, %v6003_v58 }
 0xcf3   :  { %v5032_v26 = vpop.f32.mrb[26].mxu1 }
 0xcf4   :  { %v2188_v28 = vadd.f32 %v5032_v26, %v4626_v52  ;;  %v2182_v29 = vpop.f32.mrb[27].mxu1 }
 0xcf5   :  { %v2183_v30 = vadd.f32 %v4626_v52, %v2182_v29 }
 0xcf6   :  { %v2206_v31 = vmul.f32 0.044715, %v2188_v28  ;;  %v2202_v5 = vmul.f32 0.5, %v2188_v28 }
 0xcf7   :  { %v2205_v33 = vmul.f32 0.044715, %v2183_v30  ;;  %v2201_v3 = vmul.f32 0.5, %v2183_v30 }
 0xcf8   :  { %v2210_v34 = vmul.f32 %v2206_v31, %v2188_v28 }
 0xcf9   :  { %v2209_v35 = vmul.f32 %v2205_v33, %v2183_v30 }
 0xcfa   :  { %v2214_v36 = vmul.f32 %v2210_v34, %v2188_v28 }
 0xcfb   :  { %v2213_v38 = vmul.f32 %v2209_v35, %v2183_v30 }
 0xcfc   :  { %v2218_v39 = vadd.f32 %v2214_v36, %v2188_v28 }
 0xcfd   :  { %v2217_v40 = vadd.f32 %v2213_v38, %v2183_v30 }
 0xcfe   :  { %v2222_v41 = vmul.f32 0.7978846, %v2218_v39  ;;  %v5035_v42 = vpop.f32.mrb[28].mxu1 }
 0xcff   :  { %v2198_v45 = vadd.f32 %v5035_v42, %v4626_v52  ;;  %v2192_v46 = vpop.f32.mrb[29].mxu1  ;;  %v2221_v56 = vmul.f32 0.7978846, %v2217_v40 }
 0xd00   :  { %5406 = vtanh.f32 %v2222_v41  ;;  %v2193_v62 = vadd.f32 %v4626_v52, %v2192_v46 }
 0xd01   :  { %v2208_v47 = vmul.f32 0.044715, %v2198_v45  ;;  %5408 = vtanh.f32 %v2221_v56  ;;  %v2204_v43 = vmul.f32 0.5, %v2198_v45 }
 0xd02   :  { %v2207_v48 = vmul.f32 0.044715, %v2193_v62  ;;  %v2203_v17 = vmul.f32 0.5, %v2193_v62 }
 0xd03   :  { %v2212_v50 = vmul.f32 %v2208_v47, %v2198_v45 }
 0xd04   :  { %v2211_v51 = vmul.f32 %v2207_v48, %v2193_v62 }
 0xd05   :  { %v2216_v54 = vmul.f32 %v2212_v50, %v2198_v45 }
 0xd06   :  { %v2215_v55 = vmul.f32 %v2211_v51, %v2193_v62 }
 0xd07   :  { %v2220_v57 = vadd.f32 %v2216_v54, %v2198_v45 }
 0xd08   :  { %v2219_v59 = vadd.f32 %v2215_v55, %v2193_v62 }
 0xd09   :  { %v2224_v60 = vmul.f32 0.7978846, %v2220_v57  ;;  %v2423_v57 = vld [vmem:[#allocation4 + $0x20] sm:$0xff] }
 0xd0a   :  { %v5407_v63 = vpop.eup %5406  ;;  %v2223_v0 = vmul.f32 0.7978846, %v2219_v59  ;;  %v2424_v59 = vld [vmem:[#allocation4 + $0x28] sm:$0xff] }
 0xd0b   :  { %v5409_v1 = vpop.eup %5408  ;;  %v2230_v2 = vadd.f32 1.0, %v5407_v63  ;;  %5410 = vtanh.f32 %v2224_v60  ;;  %v5280_v60 = vpack.c.bf16 %v2424_v59, %v2423_v57  ;;  %v2425_v63 = vld [vmem:[#allocation4 + $0x30] sm:$0xff] }
 0xd0c   :  { %v2229_v4 = vadd.f32 1.0, %v5409_v1  ;;  %5412 = vtanh.f32 %v2223_v0  ;;  %v2426_v0 = vld [vmem:[#allocation4 + $0x38] sm:$0xff] }
 0xd0d   :  { %v2234_v10 = vmul.f32 %v2230_v2, %v2202_v5  ;;  %5281 = vmatprep.subr.bf16.mxu1 %v5280_v60  ;;  %v5284_v1 = vpack.c.bf16 %v2426_v0, %v2425_v63 }
 0xd0e   :  { %v2233_v8 = vmul.f32 %v2229_v4, %v2201_v3  ;;  %5283 = vmatpush3.bf16.msra.mxu1 %v5280_v60 }
 0xd0f   :  { %5285 = vmatprep.subr.bf16.mxu1 %v5284_v1 }
 0xd10   :  { %5052 = vmatprep.mubr.msk.f32.mxu0 %vm2250_vm9, %v2233_v8 }
 0xd11   :  { %5053 = vmatmul.mubr.msk.f32.vlgmr.msra.gmra.mrb[18].mxu0 %vm2250_vm9, %v2234_v10 }
 0xd12   :  { %5287 = vmatpush3.bf16.msra.mxu1 %v5284_v1 }
 0xd13   :  { %5072 = vmatprep.subr.mxu1 %v5589_v53 }
 0xd15   :  { %v5411_v11 = vpop.eup %5410 }
 0xd16   :  { %v5413_v12 = vpop.eup %5412  ;;  %v2232_v15 = vadd.f32 1.0, %v5411_v11 }
 0xd17   :  { %v2231_v44 = vadd.f32 1.0, %v5413_v12 }
 0xd18   :  { %v2236_v18 = vmul.f32 %v2232_v15, %v2204_v43 }
 0xd19   :  { %v2235_v61 = vmul.f32 %v2231_v44, %v2203_v17 }
 0xd1b   :  { %5055 = vmatprep.mubr.msk.f32.mxu0 %vm2250_vm9, %v2235_v61 }
 0xd1c   :  { %5056 = vmatmul.mubr.msk.f32.gmra.mrb[20].mxu0 %vm2250_vm9, %v2236_v18  ;;  %v4636_v18 = vld [vmem:[%s6350_s8 + $0x6] ss:$0 sm:$0xff] }
 0xd1d   :  { %5079 = vmatprep.mubr.msk.f32.mxu0 %vm5590_vm5, %v5589_v53 }
 0xde4   :  { %v5054_v20 = vpop.f32.mrb[18].mxu0 }
 0xde5   :  { %v2335_v21 = vadd.f32 %v5054_v20, %v4631_v19  ;;  %v2329_v22 = vpop.f32.mrb[19].mxu0 }
 0xde6   :  { %v2330_v23 = vadd.f32 %v4631_v19, %v2329_v22  ;;  %v4637_v22 = vld [vmem:[%s6350_s8 + $0x7] ss:$0 sm:$0xff] }
 0xde7   :  { %v2349_v24 = vadd.f32 %v2335_v21, %v5993_v7 }
 0xde8   :  { %v2348_v49 = vadd.f32 %v2330_v23, %v5991_v6 }
 0xde9   :  { %v2357_v25 = vsel %vm266_vm4, %v2349_v24, 0.0 }
 0xdea   :  { %2358 = vadd.xlane.f32.xlu0 %v2357_v25  ;;  %v2354_v52 = vsel %vm266_vm4, %v2348_v49, 0.0 }
 0xdeb   :  { %2355 = vadd.xlane.f32.xlu1 %v2354_v52 }
 0xdef   :  { %v5057_v26 = vpop.f32.mrb[20].mxu0 }
 0xdf0   :  { %v2345_v28 = vadd.f32 %v5057_v26, %v4631_v19  ;;  %v2339_v29 = vpop.f32.mrb[21].mxu0 }
 0xdf1   :  { %v2340_v30 = vadd.f32 %v4631_v19, %v2339_v29 }
 0xdf2   :  { %v2351_v31 = vadd.f32 %v2345_v28, %v6003_v58 }
 0xdf3   :  { %v2350_v33 = vadd.f32 %v2340_v30, %v5999_v13 }
 0xdf4   :  { %v2363_v34 = vsel %vm266_vm4, %v2351_v31, 0.0 }
 0xdf5   :  { %2364 = vadd.xlane.f32.xlu0 %v2363_v34  ;;  %v2360_v7 = vsel %vm266_vm4, %v2350_v33, 0.0 }
 0xdf6   :  { %2361 = vadd.xlane.f32.xlu1 %v2360_v7  ;;  %v4639_v7 = vld [vmem:[%s6350_s8 + $0x8] ss:$0 sm:$0xff] }
 0xe77   :  { %v2359_v6 = vpop.xlane.xlu0 %2358 }
 0xe78   :  { %v2367_v35 = vmul.f32 0.03125, %v2359_v6  ;;  %v2356_v36 = vpop.xlane.xlu1 %2355 }
 0xe79   :  { %v2366_v38 = vmul.f32 0.03125, %v2356_v36 }
 0xe7a   :  { %v2371_v39 = vsub.f32 %v2349_v24, %v2367_v35 }
 0xe7b   :  { %v2370_v40 = vsub.f32 %v2348_v49, %v2366_v38 }
 0xe7c   :  { %v2375_v41 = vmul.f32 %v2371_v39, %v2371_v39 }
 0xe7d   :  { %v2374_v42 = vmul.f32 %v2370_v40, %v2370_v40 }
 0xe7e   :  { %v2381_v45 = vsel %vm266_vm4, %v2375_v41, 0.0 }
 0xe7f   :  { %2382 = vadd.xlane.f32.xlu0 %v2381_v45  ;;  %v2378_v58 = vsel %vm266_vm4, %v2374_v42, 0.0 }
 0xe80   :  { %2379 = vadd.xlane.f32.xlu1 %v2378_v58 }
 0xe82   :  { %v2365_v13 = vpop.xlane.xlu0 %2364 }
 0xe83   :  { %v2369_v46 = vmul.f32 0.03125, %v2365_v13  ;;  %v2362_v56 = vpop.xlane.xlu1 %2361 }
 0xe84   :  { %v2368_v62 = vmul.f32 0.03125, %v2362_v56 }
 0xe85   :  { %v2373_v47 = vsub.f32 %v2351_v31, %v2369_v46 }
 0xe86   :  { %v2372_v48 = vsub.f32 %v2350_v33, %v2368_v62 }
 0xe87   :  { %v2377_v50 = vmul.f32 %v2373_v47, %v2373_v47 }
 0xe88   :  { %v2376_v51 = vmul.f32 %v2372_v48, %v2372_v48 }
 0xe89   :  { %v2387_v54 = vsel %vm266_vm4, %v2377_v50, 0.0 }
 0xe8a   :  { %2388 = vadd.xlane.f32.xlu0 %v2387_v54  ;;  %v2384_v55 = vsel %vm266_vm4, %v2376_v51, 0.0 }
 0xe8b   :  { %2385 = vadd.xlane.f32.xlu1 %v2384_v55 }
 0xf0c   :  { %v2383_v2 = vpop.xlane.xlu0 %2382 }
 0xf0d   :  { %v2391_v3 = vmul.f32 0.03125, %v2383_v2  ;;  %v2380_v4 = vpop.xlane.xlu1 %2379 }
 0xf0e   :  { %v2390_v5 = vmul.f32 0.03125, %v2380_v4 }
 0xf0f   :  { %v2395_v8 = vadd.f32 1e-06, %v2391_v3 }
 0xf10   :  { %v2394_v10 = vadd.f32 1e-06, %v2390_v5 }
 0xf11   :  { %5414 = vrsqrt.f32 %v2395_v8 }
 0xf12   :  { %5416 = vrsqrt.f32 %v2394_v10 }
 0xf17   :  { %v2389_v11 = vpop.xlane.xlu0 %2388 }
 0xf18   :  { %v2393_v12 = vmul.f32 0.03125, %v2389_v11  ;;  %v2386_v15 = vpop.xlane.xlu1 %2385 }
 0xf19   :  { %v2392_v17 = vmul.f32 0.03125, %v2386_v15 }
 0xf1a   :  { %v2397_v44 = vadd.f32 1e-06, %v2393_v12 }
 0xf1b   :  { %v5415_v43 = vpop.eup %5414  ;;  %v2396_v61 = vadd.f32 1e-06, %v2392_v17 }
 0xf1c   :  { %v5417_v19 = vpop.eup %5416  ;;  %v2403_v20 = vmul.f32 %v5415_v43, %v2371_v39  ;;  %5418 = vrsqrt.f32 %v2397_v44 }
 0xf1d   :  { %5420 = vrsqrt.f32 %v2396_v61  ;;  %v2402_v21 = vmul.f32 %v5417_v19, %v2370_v40 }
 0xf1e   :  { %v2411_v23 = vmul.f32 %v4636_v18, %v2403_v20 }
 0xf1f   :  { %v2410_v24 = vmul.f32 %v4636_v18, %v2402_v21 }
 0xf20   :  { %v6065_v25 = vadd.f32 %v4637_v22, %v2411_v23 }
 0xf21   :  { %v6063_v49 = vadd.f32 %v4637_v22, %v2410_v24 }
 0xf23   :  { %5066 = vmatprep.mubr.msk.f32.mxu1 %vm266_vm4, %v6063_v49 }
 0xf24   :  { %5067 = vmatmul.mubr.msk.f32.vlgmr.msra.gmra.mrb[30].mxu1 %vm266_vm4, %v6065_v25 }
 0xf26   :  { %v5419_v52 = vpop.eup %5418 }
 0xf27   :  { %v5421_v26 = vpop.eup %5420  ;;  %v2405_v28 = vmul.f32 %v5419_v52, %v2373_v47 }
 0xf28   :  { %v2404_v29 = vmul.f32 %v5421_v26, %v2372_v48 }
 0xf29   :  { %v2413_v30 = vmul.f32 %v4636_v18, %v2405_v28 }
 0xf2a   :  { %v2412_v31 = vmul.f32 %v4636_v18, %v2404_v29 }
 0xf2b   :  { %v6073_v34 = vadd.f32 %v4637_v22, %v2413_v30 }
 0xf2c   :  { %v6071_v33 = vadd.f32 %v4637_v22, %v2412_v31  ;;  %v3188_v31 = vld [vmem:[#allocation6 + $0x20] sm:$0xff] }
 0xf2e   :  { %5069 = vmatprep.mubr.msk.f32.mxu1 %vm266_vm4, %v6071_v33 }
 0xf2f   :  { %5070 = vmatmul.mubr.msk.f32.gmra.mrb[32].mxu1 %vm266_vm4, %v6073_v34 }
 0xf30   :  { %5074 = vmatprep.mubr.msk.f32.mxu1 %vm5590_vm5, %v5589_v53 }
 0xff7   :  { %v5068_v6 = vpop.f32.mrb[30].mxu1 }
 0xff8   :  { %v6084_v35 = vadd.f32 %v5068_v6, %v4639_v7  ;;  %v2511_v36 = vpop.f32.mrb[31].mxu1 }
 0xff9   :  { %v6086_v38 = vadd.f32 %v4639_v7, %v2511_v36 }
 0xffa   :  { %2609 = vrot.lane.b32.xlu0 %v6084_v35, %s5591_s20 }
 0xffb   :  { %2532 = vrot.lane.b32.xlu1 %v6086_v38, %s5591_s20 }
0x1002   :  { %v5071_v39 = vpop.f32.mrb[32].mxu1 }
0x1003   :  { %v2521_v40 = vpop.f32.mrb[33].mxu1  ;;  %v6096_v42 = vadd.f32 %v5071_v39, %v4639_v7 }
0x1004   :  { %v6092_v41 = vadd.f32 %v4639_v7, %v2521_v40  ;;  %v3189_v7 = vld [vmem:[#allocation6 + $0x28] sm:$0xff] }
0x1005   :  { %v5288_v39 = vpack.c.bf16 %v3189_v7, %v3188_v31 }
0x1006   :  { %2686 = vrot.lane.b32.xlu1 %v6092_v41, %s5591_s20 }
0x100a   :  { %2763 = vrot.lane.b32.xlu1 %v6096_v42, %s5591_s20 }
0x106c   :  { %v2610_v45 = vpop.permute.xlu0 %2609 }
0x106d   :  { %5078 = vmatpush3.xpose.msk.msra.mxu0 %vm496_vm6, %v2610_v45  ;;  %v2533_v58 = vpop.permute.xlu1 %2532 }
0x106e   :  { %5073 = vmatpush3.xpose.msk.msra.mxu1 %vm496_vm6, %v2533_v58  ;;  %5087 = vmatprep.subr.mxu0 %v5589_v53 }
0x106f   :  { %5082 = vmatprep.subr.mxu1 %v5589_v53 }
0x1070   :  { %5080 = vmatmul.mubr.msk.f32.vlgmr.msra.gmra.mrb[22].mxu0 %vm496_vm6, %v6084_v35 }
0x1071   :  { %5075 = vmatmul.mubr.msk.f32.vlgmr.msra.gmra.mrb[34].mxu1 %vm496_vm6, %v6086_v38  ;;  %5089 = vmatprep.mubr.msk.f32.mxu0 %vm5590_vm5, %v5589_v53 }
0x1072   :  { %5084 = vmatprep.mubr.msk.f32.mxu1 %vm5590_vm5, %v5589_v53 }
0x1078   :  { %v2687_v13 = vpop.permute.xlu1 %2686 }
0x1079   :  { %5083 = vmatpush3.xpose.msk.msra.mxu1 %vm496_vm6, %v2687_v13 }
0x107a   :  { %5092 = vmatprep.subr.mxu1 %v5589_v53 }
0x107c   :  { %5085 = vmatmul.mubr.msk.f32.vlgmr.msra.gmra.mrb[36].mxu1 %vm496_vm6, %v6092_v41  ;;  %v2764_v46 = vpop.permute.xlu1 %2763 }
0x107d   :  { %5088 = vmatpush3.xpose.msk.msra.mxu0 %vm496_vm6, %v2764_v46  ;;  %5094 = vmatprep.mubr.msk.f32.mxu1 %vm5590_vm5, %v5589_v53 }
0x107e   :  { %5097 = vmatprep.subr.mxu0 %v5589_v53 }
0x1080   :  { %5090 = vmatmul.mubr.msk.f32.vlgmr.msra.gmra.mrb[24].mxu0 %vm496_vm6, %v6096_v42 }
0x1081   :  { %5099 = vmatprep.mubr.msk.f32.mxu0 %vm5590_vm5, %v5589_v53 }
0x1143   :  { %v2681_v56 = vpop.f32.mrb[22].mxu0 }
0x1144   :  { %v2682_v62 = vadd.f32 %v2681_v56, %v5853_v37  ;;  %v2604_v47 = vpop.f32.mrb[34].mxu1  ;;  %v5081_v48 = vpop.f32.mrb[23].mxu0 }
0x1145   :  { %v2605_v50 = vadd.f32 %v2604_v47, %v5849_v16  ;;  %v5076_v51 = vpop.f32.mrb[35].mxu1 }
0x1146   :  { %v2842_v54 = vsel %vm802_vm8, %v2682_v62, -inf }
0x1147   :  { %2843 = vmax.xlane.f32.xlu1 %v2842_v54  ;;  %v2839_v55 = vsel %vm802_vm8, %v2605_v50, -inf }
0x1148   :  { %2840 = vmax.xlane.f32.xlu0 %v2839_v55 }
0x114f   :  { %v2758_v57 = vpop.f32.mrb[36].mxu1 }
0x1150   :  { %v2759_v59 = vadd.f32 %v2758_v57, %v5859_v27  ;;  %v5086_v60 = vpop.f32.mrb[37].mxu1 }
0x1152   :  { %v2845_v63 = vsel %vm802_vm8, %v2759_v59, -inf }
0x1153   :  { %2846 = vmax.xlane.f32.xlu0 %v2845_v63  ;;  %v2835_v0 = vpop.f32.mrb[24].mxu0 }
0x1154   :  { %v2836_v1 = vadd.f32 %v2835_v0, %v5863_v32  ;;  %v5091_v2 = vpop.f32.mrb[25].mxu0 }
0x1156   :  { %v2848_v3 = vsel %vm802_vm8, %v2836_v1, -inf }
0x1157   :  { %2849 = vmax.xlane.f32.xlu0 %v2848_v3 }
0x11d4   :  { %v2844_v4 = vpop.xlane.xlu1 %2843 }
0x11d5   :  { %v2852_v5 = vsub.f32 %v2682_v62, %v2844_v4  ;;  %v2841_v8 = vpop.xlane.xlu0 %2840 }
0x11d6   :  { %v2851_v10 = vsub.f32 %v2605_v50, %v2841_v8 }
0x11d7   :  { %v2857_v11 = vmul.f32 1.442695, %v2852_v5 }
0x11d8   :  { %v2855_v12 = vmul.f32 1.442695, %v2851_v10 }
0x11d9   :  { %5422 = vpow2.f32 %v2857_v11 }
0x11da   :  { %5424 = vpow2.f32 %v2855_v12 }
0x11e0   :  { %v2847_v15 = vpop.xlane.xlu0 %2846 }
0x11e1   :  { %v2853_v23 = vsub.f32 %v2759_v59, %v2847_v15 }
0x11e3   :  { %v5423_v17 = vpop.eup %5422  ;;  %v2859_v24 = vmul.f32 1.442695, %v2853_v23 }
0x11e4   :  { %v5425_v44 = vpop.eup %5424  ;;  %v2850_v43 = vpop.xlane.xlu0 %2849  ;;  %v2866_v61 = vsel %vm802_vm8, %v5423_v17, 0.0 }
0x11e5   :  { %v2854_v18 = vsub.f32 %v2836_v1, %v2850_v43  ;;  %2867 = vadd.xlane.f32.xlu0 %v2866_v61  ;;  %v2863_v19 = vsel %vm802_vm8, %v5425_v44, 0.0 }
0x11e6   :  { %2864 = vadd.xlane.f32.xlu1 %v2863_v19 }
0x11e7   :  { %v2861_v20 = vmul.f32 1.442695, %v2854_v18 }
0x11e9   :  { %5426 = vpow2.f32 %v2861_v20 }
0x11ea   :  { %5428 = vpow2.f32 %v2859_v24 }
0x11f3   :  { %v5427_v21 = vpop.eup %5426 }
0x11f4   :  { %v2872_v22 = vsel %vm802_vm8, %v5427_v21, 0.0  ;;  %v5429_v52 = vpop.eup %5428 }
0x11f5   :  { %2873 = vadd.xlane.f32.xlu0 %v2872_v22  ;;  %v2869_v26 = vsel %vm802_vm8, %v5429_v52, 0.0 }
0x11f7   :  { %2883 = vrot.lane.b32.xlu1 %v6086_v38, %s5593_s22 }
0x11fb   :  { %3035 = vrot.lane.b32.xlu1 %v6092_v41, %s5593_s22 }
0x120b   :  { %2959 = vrot.lane.b32.xlu0 %v6084_v35, %s5593_s22 }
0x120f   :  { %3297 = vrot.lane.b32.xlu0 %v6086_v38, %s5595_s23 }
0x1213   :  { %3375 = vrot.lane.b32.xlu0 %v6084_v35, %s5595_s23 }
0x1217   :  { %3453 = vrot.lane.b32.xlu0 %v6092_v41, %s5595_s23 }
0x121b   :  { %3451 = vrot.lane.b32.xlu0 %v6092_v41, %s5594_s17 }
0x121f   :  { %2870 = vadd.xlane.f32.xlu1 %v2869_v26 }
0x1230   :  { %3111 = vrot.lane.b32.xlu1 %v6096_v42, %s5593_s22 }
0x1234   :  { %3295 = vrot.lane.b32.xlu1 %v6086_v38, %s5594_s17 }
0x1238   :  { %3373 = vrot.lane.b32.xlu1 %v6084_v35, %s5594_s17 }
0x123c   :  { %3531 = vrot.lane.b32.xlu1 %v6096_v42, %s5595_s23 }
0x1240   :  { %3529 = vrot.lane.b32.xlu1 %v6096_v42, %s5594_s17 }
0x1272   :  { %v2868_v29 = vpop.xlane.xlu0 %2867 }
0x1273   :  { %v2865_v28 = vpop.xlane.xlu1 %2864 }
0x1274   :  { %5430 = vrcp.f32 %v2865_v28 }
0x1275   :  { %5432 = vrcp.f32 %v2868_v29 }
0x1277   :  { %v2884_v30 = vpop.permute.xlu1 %2883 }
0x1278   :  { %5093 = vmatpush3.msra.mxu1 %v2884_v30 }
0x1279   :  { %5102 = vmatprep.subr.mxu1 %v5589_v53 }
0x127b   :  { %v3036_v40 = vpop.permute.xlu1 %3035 }
0x127e   :  { %v5431_v6 = vpop.eup %5430 }
0x127f   :  { %v2879_v36 = vmul.f32 %v5431_v6, %v5425_v44  ;;  %v5433_v58 = vpop.eup %5432 }
0x1280   :  { %v2880_v13 = vmul.f32 %v5433_v58, %v5423_v17 }
0x1281   :  { %5095 = vmatmul.mubr.msk.f32.vlgmr.msra.gmra.mrb[38].mxu1 %vm802_vm8, %v2879_v36 }
0x1282   :  { %5103 = vmatpush3.msra.mxu1 %v3036_v40  ;;  %v2874_v45 = vpop.xlane.xlu0 %2873  ;;  %5104 = vmatprep.mubr.msk.f32.mxu1 %vm5590_vm5, %v5589_v53 }
0x1283   :  { %5289 = vmatprep.subr.bf16.mxu1 %v5288_v39  ;;  %5434 = vrcp.f32 %v2874_v45 }
0x1286   :  { %v2960_v46 = vpop.permute.xlu0 %2959 }
0x1287   :  { %5098 = vmatpush3.msra.mxu0 %v2960_v46 }
0x1288   :  { %5100 = vmatmul.mubr.msk.f32.vlgmr.msra.gmra.mrb[26].mxu0 %vm802_vm8, %v2880_v13  ;;  %5107 = vmatprep.subr.mxu0 %v5589_v53 }
0x1289   :  { %5109 = vmatprep.mubr.msk.f32.mxu0 %vm5590_vm5, %v5589_v53 }
0x128a   :  { %v3298_v51 = vpop.permute.xlu0 %3297 }
0x128d   :  { %v5435_v62 = vpop.eup %5434 }
0x128e   :  { %v2882_v47 = vmul.f32 %v5435_v62, %v5427_v21  ;;  %v3376_v59 = vpop.permute.xlu0 %3375 }
0x1292   :  { %v3454_v3 = vpop.permute.xlu0 %3453 }
0x1296   :  { %v3452_v43 = vpop.permute.xlu0 %3451 }
0x12ac   :  { %v2871_v56 = vpop.xlane.xlu1 %2870 }
0x12ad   :  { %5436 = vrcp.f32 %v2871_v56 }
0x12b0   :  { %v3112_v48 = vpop.permute.xlu1 %3111 }
0x12b1   :  { %5108 = vmatpush3.msra.mxu0 %v3112_v48 }
0x12b2   :  { %5110 = vmatmul.mubr.msk.f32.vlgmr.msra.gmra.mrb[28].mxu0 %vm802_vm8, %v2882_v47  ;;  %5122 = vmatprep.subr.mxu0 %v5589_v53 }
0x12b3   :  { %5124 = vmatprep.mubr.msk.f32.mxu0 %vm5590_vm5, %v5589_v53 }
0x12b4   :  { %v3296_v50 = vpop.permute.xlu1 %3295 }
0x12b7   :  { %v5437_v54 = vpop.eup %5436 }
0x12b8   :  { %v2881_v55 = vmul.f32 %v5437_v54, %v5429_v52  ;;  %5123 = vmatpush3.xpose.msk.msra.mxu0 %vm496_vm6, %v3298_v51  ;;  %v3374_v57 = vpop.permute.xlu1 %3373 }
0x12b9   :  { %5127 = vmatprep.subr.mxu0 %v5589_v53 }
0x12ba   :  { %5105 = vmatmul.mubr.msk.f32.vlgmr.msra.gmra.mrb[40].mxu1 %vm802_vm8, %v2881_v55 }
0x12bb   :  { %5125 = vmatmul.mubr.msk.f32.vlgmr.msra.gmra.mrb[30].mxu0 %vm496_vm6, %v3296_v50  ;;  %5291 = vmatpush3.bf16.msra.mxu1 %v5288_v39 }
0x12bc   :  { %5128 = vmatpush3.xpose.msk.msra.mxu0 %vm496_vm6, %v3376_v59  ;;  %v3532_v60 = vpop.permute.xlu1 %3531  ;;  %5129 = vmatprep.mubr.msk.f32.mxu0 %vm5590_vm5, %v5589_v53  ;;  %v3956_v59 = vld [vmem:[#allocation6 + $0x38] sm:$0xff] }
0x12bd   :  { %5137 = vmatprep.subr.mxu0 %v5589_v53  ;;  %5132 = vmatprep.subr.mxu1 %v5589_v53 }
0x12bf   :  { %5130 = vmatmul.mubr.msk.f32.vlgmr.msra.gmra.mrb[32].mxu0 %vm496_vm6, %v3374_v57  ;;  %v3955_v57 = vld [vmem:[#allocation6 + $0x30] sm:$0xff] }
0x12c0   :  { %5138 = vmatpush3.xpose.msk.msra.mxu0 %vm496_vm6, %v3532_v60  ;;  %5139 = vmatprep.mubr.msk.f32.mxu0 %vm5590_vm5, %v5589_v53  ;;  %v3530_v63 = vpop.permute.xlu1 %3529  ;;  %v5292_v60 = vpack.c.bf16 %v3956_v59, %v3955_v57  ;;  %v4135_v57 = vld [vmem:[#allocation7 + $0x30] sm:$0xff]  ;;  %v4136_v59 = vld [vmem:[#allocation7 + $0x38] sm:$0xff] }
0x12c1   :  { %5147 = vmatprep.subr.mxu0 %v5589_v53 }
0x12c3   :  { %5140 = vmatmul.mubr.msk.f32.vlgmr.msra.gmra.mrb[34].mxu0 %vm496_vm6, %v3530_v63 }
0x12c4   :  { %5149 = vmatprep.mubr.msk.f32.mxu0 %vm5590_vm5, %v5589_v53 }
0x1354   :  { %v2955_v0 = vpop.f32.mrb[38].mxu1 }
0x1355   :  { %v5096_v1 = vpop.f32.mrb[39].mxu1  ;;  %5116 = vmatprep.mubr.msk.f32.mxu1 %vm496_vm6, %v2955_v0 }
0x135b   :  { %v3031_v2 = vpop.f32.mrb[26].mxu0 }
0x135c   :  { %v5101_v4 = vpop.f32.mrb[27].mxu0  ;;  %5117 = vmatmul.mubr.msk.f32.vlgmr.msra.gmra.mrb[42].mxu1 %vm496_vm6, %v3031_v2 }
0x135d   :  { %5133 = vmatpush3.xpose.msk.msra.mxu1 %vm496_vm6, %v3454_v3 }
0x135e   :  { %5142 = vmatprep.subr.mxu1 %v5589_v53 }
0x1385   :  { %v3183_v5 = vpop.f32.mrb[28].mxu0 }
0x1386   :  { %v5111_v8 = vpop.f32.mrb[29].mxu0 }
0x138d   :  { %v3107_v10 = vpop.f32.mrb[40].mxu1 }
0x138e   :  { %v5106_v11 = vpop.f32.mrb[41].mxu1  ;;  %5119 = vmatprep.mubr.msk.f32.mxu1 %vm496_vm6, %v3107_v10  ;;  %v3369_v12 = vpop.f32.mrb[30].mxu0 }
0x138f   :  { %v3370_v15 = vadd.f32 %v3369_v12, %v5849_v16  ;;  %5120 = vmatmul.mubr.msk.f32.gmra.mrb[44].mxu1 %vm496_vm6, %v3183_v5  ;;  %v5126_v17 = vpop.f32.mrb[31].mxu0 }
0x1390   :  { %5134 = vmatprep.mubr.msk.f32.mxu1 %vm5590_vm5, %v5589_v53 }
0x1391   :  { %v3607_v44 = vsel %vm802_vm8, %v3370_v15, -inf }
0x1392   :  { %3608 = vmax.xlane.f32.xlu0 %v3607_v44  ;;  %v3447_v61 = vpop.f32.mrb[32].mxu0 }
0x1393   :  { %v3448_v18 = vadd.f32 %v3447_v61, %v5853_v37  ;;  %v5131_v19 = vpop.f32.mrb[33].mxu0  ;;  %5135 = vmatmul.mubr.msk.f32.vlgmr.msra.gmra.mrb[46].mxu1 %vm496_vm6, %v3452_v43 }
0x1394   :  { %5144 = vmatprep.mubr.msk.f32.mxu1 %vm5590_vm5, %v5589_v53 }
0x1395   :  { %v3610_v16 = vsel %vm802_vm8, %v3448_v18, -inf }
0x1396   :  { %3611 = vmax.xlane.f32.xlu1 %v3610_v16  ;;  %v3603_v20 = vpop.f32.mrb[34].mxu0 }
0x1397   :  { %v5141_v21 = vpop.f32.mrb[35].mxu0  ;;  %v3604_v6 = vadd.f32 %v3603_v20, %v5863_v32 }
0x1399   :  { %v3616_v39 = vsel %vm802_vm8, %v3604_v6, -inf }
0x141f   :  { %v3609_v22 = vpop.xlane.xlu0 %3608 }
0x1420   :  { %v3619_v23 = vsub.f32 %v3370_v15, %v3609_v22 }
0x1422   :  { %v3623_v24 = vmul.f32 1.442695, %v3619_v23 }
0x1423   :  { %v3612_v37 = vpop.xlane.xlu1 %3611 }
0x1424   :  { %5438 = vpow2.f32 %v3623_v24  ;;  %v3620_v28 = vsub.f32 %v3448_v18, %v3612_v37  ;;  %v4661_v18 = vld [vmem:[%s6350_s8 + $0x9] ss:$0 sm:$0xff] }
0x1426   :  { %v3625_v29 = vmul.f32 1.442695, %v3620_v28 }
0x1428   :  { %5440 = vpow2.f32 %v3625_v29 }
0x142e   :  { %v5439_v52 = vpop.eup %5438 }
0x142f   :  { %v3631_v26 = vsel %vm802_vm8, %v5439_v52, 0.0 }
0x1430   :  { %3632 = vadd.xlane.f32.xlu1 %v3631_v26 }
0x1432   :  { %v5441_v40 = vpop.eup %5440 }
0x1441   :  { %3651 = vrot.lane.b32.xlu1 %v6086_v38, %s5596_s24  ;;  %v3634_v38 = vsel %vm802_vm8, %v5441_v40, 0.0 }
0x1445   :  { %3803 = vrot.lane.b32.xlu1 %v6092_v41, %s5596_s24 }
0x1466   :  { %v3525_v30 = vpop.f32.mrb[46].mxu1 }
0x1467   :  { %v3526_v31 = vadd.f32 %v3525_v30, %v5859_v27  ;;  %v5136_v7 = vpop.f32.mrb[47].mxu1 }
0x1469   :  { %v3613_v36 = vsel %vm802_vm8, %v3526_v31, -inf }
0x146a   :  { %3614 = vmax.xlane.f32.xlu0 %v3613_v36 }
0x146e   :  { %3617 = vmax.xlane.f32.xlu0 %v3616_v39 }
0x1472   :  { %3635 = vadd.xlane.f32.xlu0 %v3634_v38 }
0x14bd   :  { %v3633_v41 = vpop.xlane.xlu1 %3632 }
0x14be   :  { %5442 = vrcp.f32 %v3633_v41 }
0x14c1   :  { %v3652_v45 = vpop.permute.xlu1 %3651 }
0x14c2   :  { %5143 = vmatpush3.msra.mxu1 %v3652_v45 }
0x14c3   :  { %5152 = vmatprep.subr.mxu1 %v5589_v53 }
0x14c5   :  { %v3804_v13 = vpop.permute.xlu1 %3803 }
0x14c8   :  { %v5443_v27 = vpop.eup %5442 }
0x14c9   :  { %v3647_v58 = vmul.f32 %v5443_v27, %v5439_v52 }
0x14cb   :  { %5145 = vmatmul.mubr.msk.f32.vlgmr.msra.gmra.mrb[48].mxu1 %vm802_vm8, %v3647_v58 }
0x14cc   :  { %5153 = vmatpush3.msra.mxu1 %v3804_v13  ;;  %5154 = vmatprep.mubr.msk.f32.mxu1 %vm5590_vm5, %v5589_v53 }
0x14cd   :  { %5293 = vmatprep.subr.bf16.mxu1 %v5292_v60 }
0x14f7   :  { %v3615_v32 = vpop.xlane.xlu0 %3614 }
0x14f8   :  { %v3621_v46 = vsub.f32 %v3526_v31, %v3615_v32 }
0x14fa   :  { %v3627_v56 = vmul.f32 1.442695, %v3621_v46 }
0x14fb   :  { %v3618_v62 = vpop.xlane.xlu0 %3617 }
0x14fc   :  { %5444 = vpow2.f32 %v3627_v56  ;;  %v3622_v47 = vsub.f32 %v3604_v6, %v3618_v62 }
0x14fe   :  { %v3629_v48 = vmul.f32 1.442695, %v3622_v47 }
0x14ff   :  { %v3636_v63 = vpop.xlane.xlu0 %3635 }
0x1500   :  { %5446 = vpow2.f32 %v3629_v48 }
0x1501   :  { %5448 = vrcp.f32 %v3636_v63 }
0x1506   :  { %v5445_v50 = vpop.eup %5444 }
0x1507   :  { %v3637_v51 = vsel %vm802_vm8, %v5445_v50, 0.0 }
0x1508   :  { %3638 = vadd.xlane.f32.xlu1 %v3637_v51  ;;  %v4133_v51 = vld [vmem:[#allocation7 + $0x20] sm:$0xff] }
0x150a   :  { %v5447_v54 = vpop.eup %5446 }
0x150b   :  { %v3640_v55 = vsel %vm802_vm8, %v5447_v54, 0.0  ;;  %v5449_v2 = vpop.eup %5448 }
0x150c   :  { %3641 = vadd.xlane.f32.xlu0 %v3640_v55  ;;  %v3648_v3 = vmul.f32 %v5449_v2, %v5441_v40 }
0x1519   :  { %3879 = vrot.lane.b32.xlu1 %v6096_v42, %s5596_s24 }
0x1522   :  { %3727 = vrot.lane.b32.xlu0 %v6084_v35, %s5596_s24 }
0x1595   :  { %v3639_v0 = vpop.xlane.xlu1 %3638 }
0x1596   :  { %5450 = vrcp.f32 %v3639_v0 }
0x1599   :  { %v3642_v1 = vpop.xlane.xlu0 %3641  ;;  %v3880_v8 = vpop.permute.xlu1 %3879 }
0x159a   :  { %5452 = vrcp.f32 %v3642_v1 }
0x159d   :  { %v3728_v4 = vpop.permute.xlu0 %3727 }
0x159e   :  { %v3723_v5 = vpop.f32.mrb[48].mxu1  ;;  %5148 = vmatpush3.msra.mxu0 %v3728_v4 }
0x159f   :  { %v5146_v42 = vpop.f32.mrb[49].mxu1  ;;  %5150 = vmatmul.mubr.msk.f32.vlgmr.msra.gmra.mrb[36].mxu0 %vm802_vm8, %v3648_v3  ;;  %5157 = vmatprep.subr.mxu0 %v5589_v53 }
0x15a0   :  { %v5451_v35 = vpop.eup %5450  ;;  %5158 = vmatpush3.msra.mxu0 %v3880_v8  ;;  %5159 = vmatprep.mubr.msk.f32.mxu0 %vm5590_vm5, %v5589_v53 }
0x15a1   :  { %v3649_v10 = vmul.f32 %v5451_v35, %v5445_v50 }
0x15a3   :  { %5155 = vmatmul.mubr.msk.f32.vlgmr.msra.gmra.mrb[50].mxu1 %vm802_vm8, %v3649_v10 }
0x15a4   :  { %v5453_v11 = vpop.eup %5452  ;;  %5166 = vmatprep.mubr.msk.f32.mxu1 %vm496_vm6, %v3723_v5  ;;  %5295 = vmatpush3.bf16.msra.mxu1 %v5292_v60  ;;  %v5300_v60 = vpack.c.bf16 %v4136_v59, %v4135_v57 }
0x15a5   :  { %v3650_v12 = vmul.f32 %v5453_v11, %v5447_v54  ;;  %v4134_v54 = vld [vmem:[#allocation7 + $0x28] sm:$0xff] }
0x15a6   :  { %v5296_v55 = vpack.c.bf16 %v4134_v54, %v4133_v51 }
0x15a7   :  { %5160 = vmatmul.mubr.msk.f32.vlgmr.msra.gmra.mrb[38].mxu0 %vm802_vm8, %v3650_v12  ;;  %v4680_v12 = vld [vmem:[%s6350_s8 + $0xc] ss:$0 sm:$0xff] }
0x15a8   :  { %5297 = vmatprep.subr.bf16.mxu0 %v5296_v55 }
0x15a9   :  { %5299 = vmatpush3.bf16.msra.mxu0 %v5296_v55 }
0x15aa   :  { %5301 = vmatprep.subr.bf16.mxu0 %v5300_v60 }
0x15ad   :  { %5303 = vmatpush3.bf16.msra.mxu0 %v5300_v60 }
0x1672   :  { %v3799_v15 = vpop.f32.mrb[36].mxu0 }
0x1673   :  { %v5151_v17 = vpop.f32.mrb[37].mxu0  ;;  %5167 = vmatmul.mubr.msk.f32.vlgmr.msra.gmra.mrb[42].mxu1 %vm496_vm6, %v3799_v15 }
0x1676   :  { %v3875_v44 = vpop.f32.mrb[50].mxu1 }
0x1677   :  { %v5156_v43 = vpop.f32.mrb[51].mxu1  ;;  %5169 = vmatprep.mubr.msk.f32.mxu1 %vm496_vm6, %v3875_v44 }
0x167a   :  { %v3951_v61 = vpop.f32.mrb[38].mxu0 }
0x167b   :  { %v5161_v53 = vpop.f32.mrb[39].mxu0  ;;  %5170 = vmatmul.mubr.msk.f32.gmra.mrb[44].mxu1 %vm496_vm6, %v3951_v61  ;;  %v4681_v61 = vld [vmem:[%s6350_s8 + $0xd] ss:$0 sm:$0xff] }
0x1746   :  { %v5168_v19 = vpop.f32.mrb[42].mxu1 }
0x1747   :  { %v5328_v16 = vadd.f32 %v5168_v19, %v4661_v18  ;;  %v4035_v20 = vpop.f32.mrb[43].mxu1 }
0x1748   :  { %v5329_v21 = vadd.f32 %v4661_v18, %v4035_v20 }
0x1749   :  { %v4059_v22 = vadd.f32 %v5328_v16, %v6065_v25 }
0x174a   :  { %v4058_v23 = vadd.f32 %v5329_v21, %v6063_v49 }
0x174b   :  { %v4067_v24 = vsel %vm266_vm4, %v4059_v22, 0.0 }
0x174c   :  { %4068 = vadd.xlane.f32.xlu1 %v4067_v24  ;;  %v4064_v52 = vsel %vm266_vm4, %v4058_v23, 0.0 }
0x174d   :  { %4065 = vadd.xlane.f32.xlu0 %v4064_v52 }
0x174e   :  { %v5171_v26 = vpop.f32.mrb[44].mxu1 }
0x174f   :  { %v4045_v37 = vpop.f32.mrb[45].mxu1  ;;  %v5330_v28 = vadd.f32 %v5171_v26, %v4661_v18 }
0x1750   :  { %v5331_v29 = vadd.f32 %v4661_v18, %v4045_v37 }
0x1751   :  { %v4061_v31 = vadd.f32 %v5330_v28, %v6073_v34  ;;  %v4688_v28 = vld [vmem:[%s6349_s7 + $0x40] sm:$0xff] }
0x1752   :  { %v4060_v30 = vadd.f32 %v5331_v29, %v6071_v33  ;;  %v4689_v29 = vld [vmem:[%s6349_s7 + $0x48] sm:$0xff] }
0x1753   :  { %v4073_v25 = vsel %vm266_vm4, %v4061_v31, 0.0 }
0x1754   :  { %v4070_v7 = vsel %vm266_vm4, %v4060_v30, 0.0 }
0x1755   :  { %4071 = vadd.xlane.f32.xlu0 %v4070_v7  ;;  %v4691_v7 = vld [vmem:[%s6349_s7 + $0x58] sm:$0xff] }
0x1759   :  { %4074 = vadd.xlane.f32.xlu0 %v4073_v25 }
0x17d9   :  { %v4069_v49 = vpop.xlane.xlu1 %4068 }
0x17da   :  { %v4077_v6 = vmul.f32 0.03125, %v4069_v49  ;;  %v4066_v36 = vpop.xlane.xlu0 %4065  ;;  %v4692_v49 = vld [vmem:[%s6349_s7 + $0x60] sm:$0xff] }
0x17db   :  { %v4076_v39 = vmul.f32 0.03125, %v4066_v36 }
0x17dc   :  { %v4081_v40 = vsub.f32 %v4059_v22, %v4077_v6  ;;  %v4693_v6 = vld [vmem:[%s6349_s7 + $0x68] sm:$0xff] }
0x17dd   :  { %v4080_v38 = vsub.f32 %v4058_v23, %v4076_v39  ;;  %v5312_v36 = vpack.c.bf16 %v4693_v6, %v4692_v49  ;;  %v4694_v39 = vld [vmem:[%s6349_s7 + $0x70] sm:$0xff] }
0x17de   :  { %v4085_v41 = vmul.f32 %v4081_v40, %v4081_v40 }
0x17df   :  { %v4084_v45 = vmul.f32 %v4080_v38, %v4080_v38 }
0x17e0   :  { %v4091_v27 = vsel %vm266_vm4, %v4085_v41, 0.0  ;;  %v4683_v41 = vld [vmem:[%s6350_s8 + $0xa] ss:$0 sm:$0xff] }
0x17e1   :  { %4092 = vadd.xlane.f32.xlu0 %v4091_v27  ;;  %v4088_v33 = vsel %vm266_vm4, %v4084_v45, 0.0 }
0x17e2   :  { %4089 = vadd.xlane.f32.xlu1 %v4088_v33  ;;  %v4072_v34 = vpop.xlane.xlu0 %4071 }
0x17e3   :  { %v4078_v58 = vmul.f32 0.03125, %v4072_v34 }
0x17e5   :  { %v4082_v13 = vsub.f32 %v4060_v30, %v4078_v58  ;;  %v5304_v30 = vpack.c.bf16 %v4689_v29, %v4688_v28 }
0x17e6   :  { %v4075_v32 = vpop.xlane.xlu0 %4074 }
0x17e7   :  { %v4079_v46 = vmul.f32 0.03125, %v4075_v32  ;;  %v4086_v56 = vmul.f32 %v4082_v13, %v4082_v13  ;;  %5305 = vmatprep.subr.bf16.mxu1 %v5304_v30 }
0x17e8   :  { %5307 = vmatpush3.bf16.msra.mxu1 %v5304_v30 }
0x17e9   :  { %v4083_v62 = vsub.f32 %v4061_v31, %v4079_v46  ;;  %v4094_v47 = vsel %vm266_vm4, %v4086_v56, 0.0  ;;  %v4690_v31 = vld [vmem:[%s6349_s7 + $0x50] sm:$0xff] }
0x17ea   :  { %4095 = vadd.xlane.f32.xlu1 %v4094_v47  ;;  %v5308_v25 = vpack.c.bf16 %v4691_v7, %v4690_v31 }
0x17eb   :  { %v4087_v48 = vmul.f32 %v4083_v62, %v4083_v62 }
0x17ec   :  { %5309 = vmatprep.subr.bf16.mxu1 %v5308_v25 }
0x17ed   :  { %v4097_v50 = vsel %vm266_vm4, %v4087_v48, 0.0  ;;  %5311 = vmatpush3.bf16.msra.mxu1 %v5308_v25 }
0x17ee   :  { %4098 = vadd.xlane.f32.xlu0 %v4097_v50  ;;  %5313 = vmatprep.subr.bf16.mxu1 %v5312_v36 }
0x17f1   :  { %5315 = vmatpush3.bf16.msra.mxu1 %v5312_v36 }
0x186e   :  { %v4093_v63 = vpop.xlane.xlu0 %4092 }
0x186f   :  { %v4101_v0 = vmul.f32 0.03125, %v4093_v63  ;;  %v4090_v1 = vpop.xlane.xlu1 %4089 }
0x1870   :  { %v4100_v2 = vmul.f32 0.03125, %v4090_v1 }
0x1871   :  { %v4105_v3 = vadd.f32 1e-06, %v4101_v0 }
0x1872   :  { %v4104_v4 = vadd.f32 1e-06, %v4100_v2 }
0x1873   :  { %5454 = vrsqrt.f32 %v4105_v3 }
0x1874   :  { %5456 = vrsqrt.f32 %v4104_v4 }
0x1877   :  { %v4096_v5 = vpop.xlane.xlu1 %4095 }
0x1878   :  { %v4102_v8 = vmul.f32 0.03125, %v4096_v5 }
0x187a   :  { %v4106_v42 = vadd.f32 1e-06, %v4102_v8 }
0x187b   :  { %v4099_v35 = vpop.xlane.xlu0 %4098 }
0x187c   :  { %5458 = vrsqrt.f32 %v4106_v42  ;;  %v4103_v10 = vmul.f32 0.03125, %v4099_v35 }
0x187d   :  { %v5455_v11 = vpop.eup %5454 }
0x187e   :  { %v5457_v15 = vpop.eup %5456  ;;  %v4113_v17 = vmul.f32 %v5455_v11, %v4081_v40  ;;  %v4107_v44 = vadd.f32 1e-06, %v4103_v10  ;;  %v4695_v40 = vld [vmem:[%s6349_s7 + $0x78] sm:$0xff] }
0x187f   :  { %v4112_v43 = vmul.f32 %v5457_v15, %v4080_v38  ;;  %v5316_v38 = vpack.c.bf16 %v4695_v40, %v4694_v39 }
0x1880   :  { %5460 = vrsqrt.f32 %v4107_v44  ;;  %v4121_v53 = vmul.f32 %v4680_v12, %v4113_v17 }
0x1881   :  { %v4120_v18 = vmul.f32 %v4680_v12, %v4112_v43  ;;  %5317 = vmatprep.subr.bf16.mxu1 %v5316_v38 }
0x1882   :  { %v6257_v16 = vadd.f32 %v4681_v61, %v4121_v53  ;;  %5319 = vmatpush3.bf16.msra.mxu1 %v5316_v38 }
0x1883   :  { %v6255_v19 = vadd.f32 %v4681_v61, %v4120_v18 }
0x1885   :  { %5180 = vmatprep.mubr.msk.f32.mxu0 %vm266_vm4, %v6255_v19 }
0x1886   :  { %v5459_v20 = vpop.eup %5458  ;;  %5181 = vmatmul.mubr.msk.f32.vlgmr.msra.gmra.mrb[40].mxu0 %vm266_vm4, %v6257_v16 }
0x1887   :  { %v4114_v21 = vmul.f32 %v5459_v20, %v4082_v13 }
0x1889   :  { %v4122_v22 = vmul.f32 %v4680_v12, %v4114_v21 }
0x188a   :  { %v5461_v23 = vpop.eup %5460 }
0x188b   :  { %v6263_v24 = vadd.f32 %v4681_v61, %v4122_v22  ;;  %v4115_v52 = vmul.f32 %v5461_v23, %v4083_v62 }
0x188d   :  { %5183 = vmatprep.mubr.msk.f32.mxu0 %vm266_vm4, %v6263_v24  ;;  %v4123_v26 = vmul.f32 %v4680_v12, %v4115_v52 }
0x188f   :  { %v6267_v37 = vadd.f32 %v4681_v61, %v4123_v26  ;;  %v4697_v26 = vld [vmem:[%s6350_s8 + $0xb] ss:$0 sm:$0xff] }
0x1891   :  { %5184 = vmatmul.mubr.msk.f32.gmra.mrb[42].mxu0 %vm266_vm4, %v6267_v37 }
0x1959   :  { %v5182_v45 = vpop.f32.mrb[40].mxu0 }
0x195a   :  { %v4226_v27 = vadd.f32 %v5182_v45, %v4683_v41  ;;  %v4220_v33 = vpop.f32.mrb[41].mxu0 }
0x195b   :  { %v4221_v34 = vadd.f32 %v4683_v41, %v4220_v33 }
0x195c   :  { %v4244_v58 = vmul.f32 0.044715, %v4226_v27  ;;  %v4240_v17 = vmul.f32 0.5, %v4226_v27 }
0x195d   :  { %v4243_v13 = vmul.f32 0.044715, %v4221_v34  ;;  %v4239_v12 = vmul.f32 0.5, %v4221_v34 }
0x195e   :  { %v4248_v32 = vmul.f32 %v4244_v58, %v4226_v27 }
0x195f   :  { %v4247_v46 = vmul.f32 %v4243_v13, %v4221_v34 }
0x1960   :  { %v4252_v56 = vmul.f32 %v4248_v32, %v4226_v27 }
0x1961   :  { %v4251_v62 = vmul.f32 %v4247_v46, %v4221_v34 }
0x1962   :  { %v4256_v47 = vadd.f32 %v4252_v56, %v4226_v27 }
0x1963   :  { %v4255_v48 = vadd.f32 %v4251_v62, %v4221_v34 }
0x1964   :  { %v4260_v50 = vmul.f32 0.7978846, %v4256_v47  ;;  %v5185_v51 = vpop.f32.mrb[42].mxu0 }
0x1965   :  { %v4236_v54 = vadd.f32 %v5185_v51, %v4683_v41  ;;  %v4230_v55 = vpop.f32.mrb[43].mxu0  ;;  %v4259_v57 = vmul.f32 0.7978846, %v4255_v48 }
0x1966   :  { %5462 = vtanh.f32 %v4260_v50  ;;  %v4231_v59 = vadd.f32 %v4683_v41, %v4230_v55 }
0x1967   :  { %v4246_v60 = vmul.f32 0.044715, %v4236_v54  ;;  %5464 = vtanh.f32 %v4259_v57  ;;  %v4242_v22 = vmul.f32 0.5, %v4236_v54  ;;  %v4476_v57 = vsub.s32 2, %v5842_v9 }
0x1968   :  { %v4245_v63 = vmul.f32 0.044715, %v4231_v59  ;;  %v4241_v20 = vmul.f32 0.5, %v4231_v59 }
0x1969   :  { %v4250_v0 = vmul.f32 %v4246_v60, %v4236_v54  ;;  %v4469_v60 = vsub.s32 1, %v5842_v9 }
0x196a   :  { %v4249_v1 = vmul.f32 %v4245_v63, %v4231_v59 }
0x196b   :  { %v4254_v2 = vmul.f32 %v4250_v0, %v4236_v54 }
0x196c   :  { %v4253_v3 = vmul.f32 %v4249_v1, %v4231_v59 }
0x196d   :  { %v4258_v4 = vadd.f32 %v4254_v2, %v4236_v54  ;;  %v5486_v54 = vld [vmem:[%s6343_s1] sm:$0xf] }
0x196e   :  { %v4257_v5 = vadd.f32 %v4253_v3, %v4231_v59  ;;  %v4463_v55 = vrot.slane %v5486_v54, %v5846_v14  ;;  %v4477_v59 = vrot.slane %v5486_v54, %v4476_v57  ;;  %v4470_v63 = vrot.slane %v5486_v54, %v4469_v60 }
0x196f   :  { %v4262_v8 = vmul.f32 0.7978846, %v4258_v4  ;;  %v4483_v14 = vsub.s32 3, %v5842_v9  ;;  %v4704_v9 = vld [vmem:[%s6350_s8 + $0xe] ss:$0 sm:$0xff] }
0x1970   :  { %v5463_v42 = vpop.eup %5462  ;;  %v4261_v35 = vmul.f32 0.7978846, %v4257_v5 }
0x1971   :  { %v5465_v10 = vpop.eup %5464  ;;  %v4268_v11 = vadd.f32 1.0, %v5463_v42  ;;  %5466 = vtanh.f32 %v4262_v8  ;;  %v4484_v5 = vrot.slane %v5486_v54, %v4483_v14 }
0x1972   :  { %v4267_v15 = vadd.f32 1.0, %v5465_v10  ;;  %5468 = vtanh.f32 %v4261_v35 }
0x1973   :  { %v4272_v43 = vmul.f32 %v4268_v11, %v4240_v17 }
0x1974   :  { %v4271_v44 = vmul.f32 %v4267_v15, %v4239_v12 }
0x1976   :  { %5202 = vmatprep.mubr.msk.f32.mxu1 %vm2250_vm9, %v4271_v44 }
0x1977   :  { %5203 = vmatmul.mubr.msk.f32.vlgmr.msra.gmra.mrb[52].mxu1 %vm2250_vm9, %v4272_v43 }
0x197b   :  { %v5467_v61 = vpop.eup %5466 }
0x197c   :  { %v5469_v53 = vpop.eup %5468  ;;  %v4270_v18 = vadd.f32 1.0, %v5467_v61 }
0x197d   :  { %v4269_v21 = vadd.f32 1.0, %v5469_v53 }
0x197e   :  { %v4274_v52 = vmul.f32 %v4270_v18, %v4242_v22 }
0x197f   :  { %v4273_v23 = vmul.f32 %v4269_v21, %v4241_v20 }
0x1981   :  { %5205 = vmatprep.mubr.msk.f32.mxu1 %vm2250_vm9, %v4273_v23 }
0x1982   :  { %5206 = vmatmul.mubr.msk.f32.gmra.mrb[54].mxu1 %vm2250_vm9, %v4274_v52  ;;  %v4705_v52 = vld [vmem:[%s6350_s8 + $0xf] ss:$0 sm:$0xff] }
0x1a4a   :  { %v5204_v28 = vpop.f32.mrb[52].mxu1 }
0x1a4b   :  { %v4373_v29 = vadd.f32 %v5204_v28, %v4697_v26  ;;  %v4367_v30 = vpop.f32.mrb[53].mxu1 }
0x1a4c   :  { %v4368_v31 = vadd.f32 %v4697_v26, %v4367_v30 }
0x1a4d   :  { %v4387_v7 = vadd.f32 %v4373_v29, %v6257_v16 }
0x1a4e   :  { %v4386_v25 = vadd.f32 %v4368_v31, %v6255_v19 }
0x1a4f   :  { %v4395_v49 = vsel %vm266_vm4, %v4387_v7, 0.0 }
0x1a50   :  { %4396 = vadd.xlane.f32.xlu0 %v4395_v49  ;;  %v4392_v6 = vsel %vm266_vm4, %v4386_v25, 0.0 }
0x1a51   :  { %4393 = vadd.xlane.f32.xlu1 %v4392_v6 }
0x1a55   :  { %v5207_v36 = vpop.f32.mrb[54].mxu1 }
0x1a56   :  { %v4383_v39 = vadd.f32 %v5207_v36, %v4697_v26  ;;  %v4377_v40 = vpop.f32.mrb[55].mxu1 }
0x1a57   :  { %v4378_v38 = vadd.f32 %v4697_v26, %v4377_v40 }
0x1a58   :  { %v4389_v41 = vadd.f32 %v4383_v39, %v6267_v37 }
0x1a59   :  { %v4388_v45 = vadd.f32 %v4378_v38, %v6263_v24 }
0x1a5a   :  { %v4401_v27 = vsel %vm266_vm4, %v4389_v41, 0.0 }
0x1a5b   :  { %4402 = vadd.xlane.f32.xlu0 %v4401_v27  ;;  %v4398_v16 = vsel %vm266_vm4, %v4388_v45, 0.0 }
0x1a5c   :  { %4399 = vadd.xlane.f32.xlu1 %v4398_v16 }
0x1add   :  { %v4397_v19 = vpop.xlane.xlu0 %4396 }
0x1ade   :  { %v4405_v33 = vmul.f32 0.03125, %v4397_v19  ;;  %v4394_v34 = vpop.xlane.xlu1 %4393 }
0x1adf   :  { %v4404_v58 = vmul.f32 0.03125, %v4394_v34 }
0x1ae0   :  { %v4409_v13 = vsub.f32 %v4387_v7, %v4405_v33 }
0x1ae1   :  { %v4408_v32 = vsub.f32 %v4386_v25, %v4404_v58 }
0x1ae2   :  { %v4413_v46 = vmul.f32 %v4409_v13, %v4409_v13 }
0x1ae3   :  { %v4412_v56 = vmul.f32 %v4408_v32, %v4408_v32 }
0x1ae4   :  { %v4419_v62 = vsel %vm266_vm4, %v4413_v46, 0.0 }
0x1ae5   :  { %4420 = vadd.xlane.f32.xlu0 %v4419_v62  ;;  %v4416_v37 = vsel %vm266_vm4, %v4412_v56, 0.0 }
0x1ae6   :  { %4417 = vadd.xlane.f32.xlu1 %v4416_v37 }
0x1ae8   :  { %v4403_v24 = vpop.xlane.xlu0 %4402 }
0x1ae9   :  { %v4407_v47 = vmul.f32 0.03125, %v4403_v24  ;;  %v4400_v0 = vpop.xlane.xlu1 %4399 }
0x1aea   :  { %v4406_v1 = vmul.f32 0.03125, %v4400_v0 }
0x1aeb   :  { %v4411_v48 = vsub.f32 %v4389_v41, %v4407_v47 }
0x1aec   :  { %v6322_v2 = vsub.f32 %v4388_v45, %v4406_v1 }
0x1aed   :  { %v4415_v50 = vmul.f32 %v4411_v48, %v4411_v48 }
0x1aee   :  { %v4414_v3 = vmul.f32 %v6322_v2, %v6322_v2 }
0x1aef   :  { %v4425_v51 = vsel %vm266_vm4, %v4415_v50, 0.0 }
0x1af0   :  { %4426 = vadd.xlane.f32.xlu0 %v4425_v51  ;;  %v4422_v4 = vsel %vm266_vm4, %v4414_v3, 0.0 }
0x1af7   :  { %4465 = vbcast.lane.b32.xlu1 %v4463_v55, 256 }
0x1afb   :  { %4479 = vbcast.lane.b32.xlu1 %v4477_v59, 256 }
0x1b06   :  { %4472 = vbcast.lane.b32.xlu0 %v4470_v63, 256 }
0x1b1f   :  { %4423 = vadd.xlane.f32.xlu1 %v4422_v4 }
0x1b30   :  { %4486 = vbcast.lane.b32.xlu1 %v4484_v5, 256 }
0x1b72   :  { %v4421_v42 = vpop.xlane.xlu0 %4420 }
0x1b73   :  { %v4418_v8 = vpop.xlane.xlu1 %4417  ;;  %v4429_v10 = vmul.f32 0.03125, %v4421_v42 }
0x1b74   :  { %v4428_v35 = vmul.f32 0.03125, %v4418_v8 }
0x1b75   :  { %v4433_v15 = vadd.f32 1e-06, %v4429_v10 }
0x1b76   :  { %v4432_v11 = vadd.f32 1e-06, %v4428_v35 }
0x1b77   :  { %v4466_v53 = vpop.permute.xlu1 %4465 }
0x1b78   :  { %5470 = vrsqrt.f32 %v4432_v11  ;;  %v4520_v31 = vrot.slane %v4466_v53, 4 }
0x1b79   :  { %5472 = vrsqrt.f32 %v4433_v15 }
0x1b7a   :  { %v4521_v38 = vadd.f32 %v4520_v31, %v4466_v53 }
0x1b7b   :  { %v4480_v26 = vpop.permute.xlu1 %4479 }
0x1b7c   :  { %v4532_v39 = vrot.slane %v4480_v26, 4 }
0x1b7d   :  { %v4427_v12 = vpop.xlane.xlu0 %4426 }
0x1b7e   :  { %v4431_v17 = vmul.f32 0.03125, %v4427_v12  ;;  %v4533_v34 = vadd.f32 %v4532_v39, %v4480_v26 }
0x1b80   :  { %v4435_v44 = vadd.f32 1e-06, %v4431_v17 }
0x1b81   :  { %v4473_v21 = vpop.permute.xlu0 %4472 }
0x1b82   :  { %5474 = vrsqrt.f32 %v4435_v44  ;;  %v5471_v43 = vpop.eup %5470  ;;  %v4526_v29 = vrot.slane %v4473_v21, 4 }
0x1b83   :  { %v5473_v61 = vpop.eup %5472  ;;  %v4440_v18 = vmul.f32 %v5471_v43, %v4408_v32 }
0x1b84   :  { %v4441_v20 = vmul.f32 %v5473_v61, %v4409_v13  ;;  %v4527_v6 = vadd.f32 %v4526_v29, %v4473_v21  ;;  %v4522_v13 = vrot.slane %v4521_v38, 2 }
0x1b85   :  { %v4448_v22 = vmul.f32 %v4704_v9, %v4440_v18 }
0x1b86   :  { %v4449_v28 = vmul.f32 %v4704_v9, %v4441_v20  ;;  %v4528_v19 = vrot.slane %v4527_v6, 2  ;;  %v4523_v50 = vadd.f32 %v4522_v13, %v4521_v38 }
0x1b87   :  { %v4456_v30 = vadd.f32 %v4705_v52, %v4448_v22 }
0x1b88   :  { %v4457_v49 = vadd.f32 %v4705_v52, %v4449_v28  ;;  %v4529_v62 = vadd.f32 %v4528_v19, %v4527_v6  ;;  %v4524_v0 = vrot.slane %v4523_v50, 1 }
0x1b89   :  { %v4488_v40 = vmul.f32 %v4466_v53, %v4456_v30 }
0x1b8a   :  { %v4489_v16 = vmul.f32 %v4473_v21, %v4457_v49  ;;  %v4530_v54 = vrot.slane %v4529_v62, 1  ;;  %v4525_v10 = vadd.f32 %v4524_v0, %v4523_v50 }
0x1b8b   :  { %v4492_v58 = vsel %vm266_vm4, %v4488_v40, 0.0 }
0x1b8c   :  { %v5475_v23 = vpop.eup %5474  ;;  %v4499_v56 = vsel %vm266_vm4, %v4489_v16, 0.0  ;;  %v4493_v47 = vrot.slane %v4492_v58, 4  ;;  %v4531_v14 = vadd.f32 %v4530_v54, %v4529_v62 }
0x1b8d   :  { %v4443_v7 = vmul.f32 %v5475_v23, %v4411_v48  ;;  %v4534_v48 = vrot.slane %v4533_v34, 2  ;;  %v4500_v51 = vrot.slane %v4499_v56, 4 }
0x1b8e   :  { %v4494_v59 = vadd.f32 %v4493_v47, %v4492_v58 }
0x1b8f   :  { %v4451_v45 = vmul.f32 %v4704_v9, %v4443_v7  ;;  %v4535_v60 = vadd.f32 %v4534_v48, %v4533_v34  ;;  %v4501_v1 = vadd.f32 %v4500_v51, %v4499_v56 }
0x1b90   :  { %v4495_v8 = vrot.slane %v4494_v59, 2 }
0x1b91   :  { %v4459_v32 = vadd.f32 %v4705_v52, %v4451_v45  ;;  %v4536_v42 = vrot.slane %v4535_v60, 1  ;;  %v4502_v11 = vrot.slane %v4501_v1, 2 }
0x1b92   :  { %v4496_v44 = vadd.f32 %v4495_v8, %v4494_v59 }
0x1b93   :  { %v4537_v43 = vadd.f32 %v4536_v42, %v4535_v60  ;;  %v4503_v53 = vadd.f32 %v4502_v11, %v4501_v1 }
0x1b94   :  { %v4497_v21 = vrot.slane %v4496_v44, 1 }
0x1bac   :  { %v4424_v25 = vpop.xlane.xlu1 %4423 }
0x1bad   :  { %v4430_v36 = vmul.f32 0.03125, %v4424_v25 }
0x1baf   :  { %v4434_v41 = vadd.f32 1e-06, %v4430_v36 }
0x1bb0   :  { %v4487_v27 = vpop.permute.xlu1 %4486 }
0x1bb1   :  { %5476 = vrsqrt.f32 %v4434_v41  ;;  %v4538_v33 = vrot.slane %v4487_v27, 4  ;;  %v4491_v37 = vmul.f32 %v4487_v27, %v4459_v32 }
0x1bb2   :  { %5478 = vrcp.f32 %v4531_v14 }
0x1bb3   :  { %v4539_v46 = vadd.f32 %v4538_v33, %v4487_v27  ;;  %v4513_v55 = vsel %vm266_vm4, %v4491_v37, 0.0  ;;  %5480 = vrcp.f32 %v4525_v10 }
0x1bb4   :  { %v4514_v4 = vrot.slane %v4513_v55, 4 }
0x1bb5   :  { %v4540_v24 = vrot.slane %v4539_v46, 2 }
0x1bb6   :  { %v4515_v15 = vadd.f32 %v4514_v4, %v4513_v55 }
0x1bb7   :  { %v4541_v57 = vadd.f32 %v4540_v24, %v4539_v46 }
0x1bb9   :  { %v4542_v5 = vrot.slane %v4541_v57, 1 }
0x1bbb   :  { %v5477_v63 = vpop.eup %5476  ;;  %v4543_v17 = vadd.f32 %v4542_v5, %v4541_v57 }
0x1bbc   :  { %v4442_v3 = vmul.f32 %v5477_v63, %v6322_v2  ;;  %v4516_v2 = vrot.slane %v4515_v15, 2  ;;  %v5479_v29 = vpop.eup %5478 }
0x1bbd   :  { %5482 = vrcp.f32 %v4543_v17  ;;  %v5481_v25 = vpop.eup %5480 }
0x1bbe   :  { %v4450_v35 = vmul.f32 %v4704_v9, %v4442_v3  ;;  %5484 = vrcp.f32 %v4537_v43  ;;  %v4504_v9 = vrot.slane %v4503_v53, 1  ;;  %v4517_v23 = vadd.f32 %v4516_v2, %v4515_v15 }
0x1bc0   :  { %v4458_v12 = vadd.f32 %v4705_v52, %v4450_v35  ;;  %v4498_v52 = vadd.f32 %v4497_v21, %v4496_v44  ;;  %v4505_v31 = vadd.f32 %v4504_v9, %v4503_v53  ;;  %v4518_v7 = vrot.slane %v4517_v23, 1 }
0x1bc2   :  { %v4490_v61 = vmul.f32 %v4480_v26, %v4458_v12  ;;  %v4548_v49 = vmul.f32 %v5481_v25, %v4498_v52  ;;  %v4549_v6 = vmul.f32 %v5479_v29, %v4505_v31  ;;  %v4519_v38 = vadd.f32 %v4518_v7, %v4517_v23 }
0x1bc4   :  { %v4506_v18 = vsel %vm266_vm4, %v4490_v61, 0.0  ;;  %v4557_v45 = vsel %vm4556_vm10, %v4549_v6, %v4548_v49 }
0x1bc5   :  { %v4507_v20 = vrot.slane %v4506_v18, 4 }
0x1bc7   :  { %v4508_v22 = vadd.f32 %v4507_v20, %v4506_v18  ;;  %v5483_v36 = vpop.eup %5482 }
0x1bc8   :  { %v5485_v40 = vpop.eup %5484  ;;  %v4551_v27 = vmul.f32 %v5483_v36, %v4519_v38 }
0x1bc9   :  { %v4509_v28 = vrot.slane %v4508_v22, 2 }
0x1bcb   :  { %v4510_v30 = vadd.f32 %v4509_v28, %v4508_v22 }
0x1bcd   :  { %v4511_v26 = vrot.slane %v4510_v30, 1 }
0x1bcf   :  { %v4512_v39 = vadd.f32 %v4511_v26, %v4510_v30 }
0x1bd1   :  { %v4550_v41 = vmul.f32 %v5485_v40, %v4512_v39 }
0x1bd3   :  { %v4559_v16 = vsel %vm4558_vm11, %v4550_v41, %v4557_v45 }
0x1bd4   :  { %v4561_v19 = vsel %vm4560_vm12, %v4551_v27, %v4559_v16 }
0x1bd5   :  { %4564 = vst.msk [vmem:[%s6351_s9] sm:$0xf] %vm4563_vm13, %v4561_v19 }
0x1bd6   :  { %4569 = vsyncpa [#allocation3], 1 }
0x1bd7   :  { %4570 = vsyncpa [#allocation5], 1 }
0x1bd8   :  { %4571 = vsyncpa [#allocation8], 1 }

</bundles_post_ra>
